<compile_context>
chip_gen: v7x
topology: tpu7x:2x2x1
jax: 0.10.0
libtpu: 0.0.40
codegen_flags: <defaults>
</compile_context>

<pallas_src>
import functools

import jax
import jax.numpy as jnp
from jax import lax
from jax.experimental import pallas as pl
from jax.experimental.pallas import tpu as pltpu

_VMEM_LIMIT = 64 * 1024 * 1024


def _round_up(x, m):
    return (x + m - 1) // m * m


def _pick_tile(n, candidates):
    """Largest candidate that exactly divides n (caller guarantees one does)."""
    for c in candidates:
        if n % c == 0:
            return c
    return n


def _choose_tc(T, B_pad, H_pad):
    """Time-chunk length: a multiple-of-8 divisor of round_up(T, 8), capped so
    the double-buffered bf16 gx+y chunk blocks stay well inside scoped VMEM."""
    T8 = _round_up(T, 8)
    bytes_per_step = B_pad * (4 * H_pad + H_pad) * 2          # bf16 gx + y rows
    vmem_cap = max(8, (24 * 1024 * 1024) // (2 * bytes_per_step))
    limit = min(64, vmem_cap, T8)
    tc = 8
    for cand in range(8, limit + 1, 8):
        if T8 % cand == 0:
            tc = cand
    return tc, T8


# ----------------------- tiled matmul + bias (MXU) kernel ----------------------
def _matmul_bias_kernel(x_ref, w_ref, b_ref, o_ref, acc_ref):
    k = pl.program_id(2)

    @pl.when(k == 0)
    def _():
        acc_ref[...] = jnp.zeros_like(acc_ref)

    acc_ref[...] += jnp.dot(x_ref[...], w_ref[...],
                            preferred_element_type=jnp.float32)

    @pl.when(k == pl.num_programs(2) - 1)
    def _():
        o_ref[...] = (acc_ref[...] + b_ref[...]).astype(o_ref.dtype)


def matmul_bias(x, w, b, *, out_dtype):
    """(N, K) @ (K, V) + b[V] with pre-padded bf16 operands.
       Invariants: N % 8 == 0, K % 128 == 0, V % 128 == 0 (so tiles divide
       exactly and no output slice/copy is needed).  f32 accumulation."""
    N, K = x.shape
    V = w.shape[1]
    tm = _pick_tile(N, (256, 128, 64, 32, 16, 8))
    tn = _pick_tile(V, (512, 256, 128))
    tk = _pick_tile(K, (512, 256, 128))
    b2 = b.reshape(1, V)

    return pl.pallas_call(
        _matmul_bias_kernel,
        out_shape=jax.ShapeDtypeStruct((N, V), out_dtype),
        grid=(N // tm, V // tn, K // tk),
        in_specs=[
            pl.BlockSpec((tm, tk), lambda i, j, k: (i, k)),
            pl.BlockSpec((tk, tn), lambda i, j, k: (k, j)),
            pl.BlockSpec((1, tn), lambda i, j, k: (0, j)),
        ],
        out_specs=pl.BlockSpec((tm, tn), lambda i, j, k: (i, j)),
        scratch_shapes=[pltpu.VMEM((tm, tn), jnp.float32)],
        compiler_params=pltpu.CompilerParams(
            dimension_semantics=("parallel", "parallel", "arbitrary"),
            vmem_limit_bytes=_VMEM_LIMIT),
    )(x, w, b2)


# --------------------------- LSTM recurrence kernel ----------------------------
def _lstm_recurrent_kernel(gx_ref, whh_ref, y_ref, hT_ref, cT_ref,
                           h_sc, c_sc, *, tc, t_last, unroll):
    """Grid = (batch blocks, time chunks).  gx_ref already holds
    x @ W_ih^T + (b_ih + b_hh) in bf16; per step we do one small
    h @ W_hh^T (bf16 operands, f32 accumulate) plus VPU/EUP elementwise ops.
    h_sc / c_sc persist across time chunks and are reset at chunk 0."""
    chunk = pl.program_id(1)
    H = h_sc.shape[-1]                       # padded hidden size (mult of 128)

    @pl.when(chunk == 0)
    def _():
        h_sc[...] = jnp.zeros_like(h_sc)
        c_sc[...] = jnp.zeros_like(c_sc)

    def step(i, carry):
        h, c = carry                         # f32 (Bt, H_pad)
        gates = gx_ref[i].astype(jnp.float32) + jnp.dot(
            h.astype(jnp.bfloat16), whh_ref[...],
            preferred_element_type=jnp.float32)
        # PyTorch gate order: i, f, g, o — lane-aligned H_pad slices.
        i_g = jax.nn.sigmoid(gates[:, 0 * H:1 * H])
        f_g = jax.nn.sigmoid(gates[:, 1 * H:2 * H])
        g_g = jnp.tanh(gates[:, 2 * H:3 * H])
        o_g = jax.nn.sigmoid(gates[:, 3 * H:4 * H])
        c_new = f_g * c + i_g * g_g
        h_new = o_g * jnp.tanh(c_new)
        y_ref[i] = h_new.astype(y_ref.dtype)

        @pl.when(chunk * tc + i == t_last)   # write final state exactly once
        def _():
            hT_ref[...] = h_new
            cT_ref[...] = c_new

        return h_new, c_new

    h, c = lax.fori_loop(0, tc, step, (h_sc[...], c_sc[...]), unroll=unroll)
    h_sc[...] = h
    c_sc[...] = c


def lstm_layer_recurrence(gates_x, whh_t_bf16, *, tc, t_real):
    """gates_x: (T_pad, B_pad, 4*H_pad) bf16 precomputed input projection.
       whh_t_bf16: (H_pad, 4*H_pad) bf16 (resident).
       Returns y (T_pad, B_pad, H_pad) bf16 and h_T, c_T (B_pad, H_pad) f32."""
    T_pad, B_pad, G = gates_x.shape
    H_pad = G // 4
    n_chunks = T_pad // tc
    nb = 2 if B_pad % 16 == 0 else 1         # megacore batch split (v7x)
    Bt = B_pad // nb
    unroll = tc if tc <= 8 else 8

    kernel = functools.partial(_lstm_recurrent_kernel, tc=tc,
                               t_last=t_real - 1, unroll=unroll)
    return pl.pallas_call(
        kernel,
        out_shape=(
            jax.ShapeDtypeStruct((T_pad, B_pad, H_pad), jnp.bfloat16),
            jax.ShapeDtypeStruct((B_pad, H_pad), jnp.float32),
            jax.ShapeDtypeStruct((B_pad, H_pad), jnp.float32),
        ),
        grid=(nb, n_chunks),
        in_specs=[
            pl.BlockSpec((tc, Bt, G), lambda b, c: (c, b, 0)),      # gx chunk
            pl.BlockSpec((H_pad, G), lambda b, c: (0, 0)),          # W_hh^T resident
        ],
        out_specs=(
            pl.BlockSpec((tc, Bt, H_pad), lambda b, c: (c, b, 0)),  # y chunk
            pl.BlockSpec((Bt, H_pad), lambda b, c: (b, 0)),         # h_T resident
            pl.BlockSpec((Bt, H_pad), lambda b, c: (b, 0)),         # c_T resident
        ),
        scratch_shapes=[
            pltpu.VMEM((Bt, H_pad), jnp.float32),                   # h state
            pltpu.VMEM((Bt, H_pad), jnp.float32),                   # c state
        ],
        compiler_params=pltpu.CompilerParams(
            dimension_semantics=("parallel", "arbitrary"),          # batch ∥, time serial
            vmem_limit_bytes=_VMEM_LIMIT),
    )(gates_x, whh_t_bf16)


# --------------------------- parameter preparation -----------------------------
def prepare_params(params, *, hidden_dim):
    """One-time prep: transpose, pre-sum biases, pad H -> H_pad with gate blocks
    at k*H_pad (lane-aligned slices), cast matmul weights to bf16, and fold the
    embedding + layer-0 input projection into a single (vocab, 4*H_pad) table."""
    H = hidden_dim
    H_pad = _round_up(H, 128)

    def pad_gate_cols(w_t):                  # (D, 4H) -> (D, 4*H_pad)
        D = w_t.shape[0]
        w4 = w_t.reshape(D, 4, H)
        w4 = jnp.pad(w4, ((0, 0), (0, 0), (0, H_pad - H)))
        return w4.reshape(D, 4 * H_pad)

    def pad_bias(b_ih, b_hh):
        return jnp.pad((b_ih + b_hh).reshape(4, H),
                       ((0, 0), (0, H_pad - H))).reshape(4 * H_pad)

    lstm = params["lstm"]

    # Fused embedding + layer-0 projection table (f32 math, stored bf16).
    w_ih0_t = pad_gate_cols(jnp.transpose(lstm[0]["w_ih"])).astype(jnp.float32)
    bias0 = pad_bias(lstm[0]["b_ih"], lstm[0]["b_hh"]).astype(jnp.float32)
    gate_table0 = (params["embed"].astype(jnp.float32) @ w_ih0_t
                   + bias0).astype(jnp.bfloat16)               # (vocab, 4*H_pad)

    layers = []
    for li, layer in enumerate(lstm):
        if li == 0:
            w_ih_t, bias = None, None                          # handled by table
        else:
            w_ih_t = pad_gate_cols(jnp.transpose(layer["w_ih"]))     # (H, 4H_pad)
            w_ih_t = jnp.pad(w_ih_t, ((0, H_pad - H), (0, 0))).astype(jnp.bfloat16)
            bias = pad_bias(layer["b_ih"], layer["b_hh"]).astype(jnp.float32)
        w_hh_t = pad_gate_cols(jnp.transpose(layer["w_hh"]))          # (H, 4H_pad)
        w_hh_t = jnp.pad(w_hh_t, ((0, H_pad - H), (0, 0))).astype(jnp.bfloat16)
        layers.append({"w_ih_t": w_ih_t, "w_hh_t": w_hh_t, "bias": bias})

    V = params["fc_b"].shape[0]
    V_pad = _round_up(V, 128)
    fc_w_t = jnp.pad(jnp.transpose(params["fc_w"]),
                     ((0, H_pad - H), (0, V_pad - V))).astype(jnp.bfloat16)
    fc_b = jnp.pad(params["fc_b"], (0, V_pad - V)).astype(jnp.float32)

    return {
        "gate_table0": gate_table0,
        "lstm": layers,
        "fc_w_t": fc_w_t,
        "fc_b": fc_b,
    }


# --------------------------------- full model ----------------------------------
def char_lstm_forward(prepped, tokens, *, hidden_dim, vocab_size):
    """tokens: (B, T) int32.  Returns (logits (B, T, V), (h_n, c_n)) like PyTorch."""
    B, T = tokens.shape
    H = hidden_dim
    H_pad = _round_up(H, 128)
    B_pad = _round_up(B, 8)
    tc, T_pad = _choose_tc(T, B_pad, H_pad)
    V = vocab_size
    V_pad = prepped["fc_b"].shape[0]

    # Fused embedding + layer-0 input projection: one table gather, time-major.
    tok_t = jnp.pad(jnp.transpose(tokens).astype(jnp.int32),
                    ((0, T_pad - T), (0, B_pad - B)))            # pad with token 0
    gx = jnp.take(prepped["gate_table0"], tok_t, axis=0)         # (T_pad,B_pad,4H_pad) bf16

    x = None
    h_fin, c_fin = [], []
    for li, layer in enumerate(prepped["lstm"]):
        if li > 0:
            # Hoisted input projection for deeper layers: one big bf16 MXU matmul.
            gx = matmul_bias(x.reshape(T_pad * B_pad, H_pad),
                             layer["w_ih_t"], layer["bias"],
                             out_dtype=jnp.bfloat16)
            gx = gx.reshape(T_pad, B_pad, 4 * H_pad)
        x, h_T, c_T = lstm_layer_recurrence(gx, layer["w_hh_t"], tc=tc, t_real=T)
        h_fin.append(h_T[:B, :H])
        c_fin.append(c_T[:B, :H])

    # FC head on the bf16 time-major activation slab (single tiled matmul).
    logits = matmul_bias(x.reshape(T_pad * B_pad, H_pad),
                         prepped["fc_w_t"], prepped["fc_b"],
                         out_dtype=jnp.float32)
    logits = logits.reshape(T_pad, B_pad, V_pad)[:T, :B, :V]
    logits = jnp.transpose(logits, (1, 0, 2))                    # (B, T, V)
    hidden = (jnp.stack(h_fin, axis=0), jnp.stack(c_fin, axis=0))  # (L, B, H)
    return logits, hidden


def init_params(key, vocab_size, embed_dim, hidden_dim, num_layers):
    keys = jax.random.split(key, 3 + 4 * num_layers)
    scale = 0.1
    params = {
        "embed": scale * jax.random.normal(keys[0], (vocab_size, embed_dim), jnp.float32),
        "fc_w": scale * jax.random.normal(keys[1], (vocab_size, hidden_dim), jnp.float32),
        "fc_b": scale * jax.random.normal(keys[2], (vocab_size,), jnp.float32),
        "lstm": [],
    }
    for l in range(num_layers):
        d_in = embed_dim if l == 0 else hidden_dim
        k = keys[3 + 4 * l: 3 + 4 * (l + 1)]
        params["lstm"].append({
            "w_ih": scale * jax.random.normal(k[0], (4 * hidden_dim, d_in), jnp.float32),
            "w_hh": scale * jax.random.normal(k[1], (4 * hidden_dim, hidden_dim), jnp.float32),
            "b_ih": scale * jax.random.normal(k[2], (4 * hidden_dim,), jnp.float32),
            "b_hh": scale * jax.random.normal(k[3], (4 * hidden_dim,), jnp.float32),
        })
    return params


if __name__ == "__main__":
    # Small shapes consistent with the module's forward.
    VOCAB, EMBED, HIDDEN, LAYERS = 64, 32, 32, 2
    B, T = 2, 8

    key = jax.random.PRNGKey(0)
    pkey, xkey = jax.random.split(key)
    params = init_params(pkey, VOCAB, EMBED, HIDDEN, LAYERS)
    prepped = prepare_params(params, hidden_dim=HIDDEN)
    tokens = jax.random.randint(xkey, (B, T), 0, VOCAB, dtype=jnp.int32)

    fwd = jax.jit(functools.partial(char_lstm_forward,
                                    hidden_dim=HIDDEN, vocab_size=VOCAB))
    logits, (h_n, c_n) = fwd(prepped, tokens)
    jax.block_until_ready((logits, h_n, c_n))

    assert logits.shape == (B, T, VOCAB)
    assert h_n.shape == (LAYERS, B, HIDDEN) and c_n.shape == (LAYERS, B, HIDDEN)
    print("KERNEL_OK")
</pallas_src>

<mosaic_0001>
module attributes {stable_mosaic.version = 11 : i64} {
  func.func @_lstm_recurrent_kernel(%arg0: i32, %arg1: i32, %arg2: memref<8x8x512xbf16, #tpu.memory_space<vmem>>, %arg3: memref<128x512xbf16, #tpu.memory_space<vmem>>, %arg4: memref<8x8x128xbf16, #tpu.memory_space<vmem>>, %arg5: memref<8x128xf32, #tpu.memory_space<vmem>>, %arg6: memref<8x128xf32, #tpu.memory_space<vmem>>, %arg7: memref<8x128xf32, #tpu.memory_space<vmem>>, %arg8: memref<8x128xf32, #tpu.memory_space<vmem>>) attributes {dimension_semantics = [#tpu.dimension_semantics<parallel>, #tpu.dimension_semantics<arbitrary>], iteration_bounds = array<i64: 1, 1>, scalar_prefetch = 0 : i64, scratch_operands = 2 : i64, tpu.core_type = #tpu.core_type<tc>, window_params = [{transform_indices = @transform_0, window_bounds = array<i64: 8, 8, 512>}, {pipeline_mode = #tpu.pipeline_mode<synchronous>, transform_indices = @transform_1, window_bounds = array<i64: 128, 512>}, {transform_indices = @transform_2, window_bounds = array<i64: 8, 8, 128>}, {transform_indices = @transform_3, window_bounds = array<i64: 8, 128>}, {transform_indices = @transform_4, window_bounds = array<i64: 8, 128>}]} {
    %c0_i32 = arith.constant 0 : i32
    %0 = arith.cmpi eq, %arg1, %c0_i32 : i32
    %1 = arith.extui %0 : i1 to i32
    %c0_i32_0 = arith.constant 0 : i32
    %2 = arith.cmpi ne, %1, %c0_i32_0 : i32
    scf.if %2 {
      %cst_112 = arith.constant 0.000000e+00 : f32
      %351 = vector.broadcast %cst_112 : f32 to vector<8x128xf32>
      %c0_113 = arith.constant 0 : index
      %c0_114 = arith.constant 0 : index
      %352 = vector.load %arg7[%c0_113, %c0_114] : memref<8x128xf32, #tpu.memory_space<vmem>>, vector<8x128xf32>
      tpu.vector_store %arg7[%c0_113, %c0_114], %351 {strides = array<i32>} : memref<8x128xf32, #tpu.memory_space<vmem>>, vector<8x128xf32>,
      %cst_115 = arith.constant 0.000000e+00 : f32
      %353 = vector.broadcast %cst_115 : f32 to vector<8x128xf32>
      %c0_116 = arith.constant 0 : index
      %c0_117 = arith.constant 0 : index
      %354 = vector.load %arg8[%c0_116, %c0_117] : memref<8x128xf32, #tpu.memory_space<vmem>>, vector<8x128xf32>
      tpu.vector_store %arg8[%c0_116, %c0_117], %353 {strides = array<i32>} : memref<8x128xf32, #tpu.memory_space<vmem>>, vector<8x128xf32>,
    } else {
    }
    %c0 = arith.constant 0 : index
    %c0_1 = arith.constant 0 : index
    %3 = vector.load %arg7[%c0, %c0_1] : memref<8x128xf32, #tpu.memory_space<vmem>>, vector<8x128xf32>
    %c0_2 = arith.constant 0 : index
    %c0_3 = arith.constant 0 : index
    %4 = vector.load %arg8[%c0_2, %c0_3] : memref<8x128xf32, #tpu.memory_space<vmem>>, vector<8x128xf32>
    %c0_i32_4 = arith.constant 0 : i32
    %5 = arith.index_cast %c0_i32_4 : i32 to index
    %c0_5 = arith.constant 0 : index
    %c0_6 = arith.constant 0 : index
    %6 = vector.load %arg2[%5, %c0_5, %c0_6] : memref<8x8x512xbf16, #tpu.memory_space<vmem>>, vector<1x8x512xbf16>
    %7 = vector.shape_cast %6 : vector<1x8x512xbf16> to vector<8x512xbf16>
    %8 = arith.extf %7 : vector<8x512xbf16> to vector<8x512xf32>
    %9 = arith.truncf %3 : vector<8x128xf32> to vector<8x128xbf16>
    %c0_7 = arith.constant 0 : index
    %c0_8 = arith.constant 0 : index
    %10 = vector.load %arg3[%c0_7, %c0_8] : memref<128x512xbf16, #tpu.memory_space<vmem>>, vector<128x512xbf16>
    %cst = arith.constant dense<0.000000e+00> : vector<8x512xf32>
    %11 = tpu.matmul %9, %10, %cst {dimension_numbers = #tpu.dot_dimension_numbers<[1], [0], [0], [1], [0, 0, 1, 1], [], []>} : vector<8x128xbf16>, vector<128x512xbf16>, vector<8x512xf32> -> vector<8x512xf32>
    %12 = arith.addf %8, %11 : vector<8x512xf32>
    %13 = vector.extract_strided_slice %12 {offsets = [0, 0], sizes = [8, 128], strides = [1, 1]} : vector<8x512xf32> to vector<8x128xf32>
    %14 = arith.negf %13 : vector<8x128xf32>
    %15 = math.exp %14 : vector<8x128xf32>
    %cst_9 = arith.constant 1.000000e+00 : f32
    %16 = vector.broadcast %cst_9 : f32 to vector<8x128xf32>
    %17 = arith.addf %16, %15 : vector<8x128xf32>
    %18 = arith.divf %16, %17 : vector<8x128xf32>
    %19 = vector.extract_strided_slice %12 {offsets = [0, 128], sizes = [8, 128], strides = [1, 1]} : vector<8x512xf32> to vector<8x128xf32>
    %20 = arith.negf %19 : vector<8x128xf32>
    %21 = math.exp %20 : vector<8x128xf32>
    %cst_10 = arith.constant 1.000000e+00 : f32
    %22 = vector.broadcast %cst_10 : f32 to vector<8x128xf32>
    %23 = arith.addf %22, %21 : vector<8x128xf32>
    %24 = arith.divf %22, %23 : vector<8x128xf32>
    %25 = vector.extract_strided_slice %12 {offsets = [0, 256], sizes = [8, 128], strides = [1, 1]} : vector<8x512xf32> to vector<8x128xf32>
    %26 = math.tanh %25 : vector<8x128xf32>
    %27 = vector.extract_strided_slice %12 {offsets = [0, 384], sizes = [8, 128], strides = [1, 1]} : vector<8x512xf32> to vector<8x128xf32>
    %28 = arith.negf %27 : vector<8x128xf32>
    %29 = math.exp %28 : vector<8x128xf32>
    %cst_11 = arith.constant 1.000000e+00 : f32
    %30 = vector.broadcast %cst_11 : f32 to vector<8x128xf32>
    %31 = arith.addf %30, %29 : vector<8x128xf32>
    %32 = arith.divf %30, %31 : vector<8x128xf32>
    %33 = arith.mulf %24, %4 : vector<8x128xf32>
    %34 = arith.mulf %18, %26 : vector<8x128xf32>
    %35 = arith.addf %33, %34 : vector<8x128xf32>
    %36 = math.tanh %35 : vector<8x128xf32>
    %37 = arith.mulf %32, %36 : vector<8x128xf32>
    %38 = arith.truncf %37 : vector<8x128xf32> to vector<8x128xbf16>
    %39 = arith.index_cast %c0_i32_4 : i32 to index
    %c0_12 = arith.constant 0 : index
    %c0_13 = arith.constant 0 : index
    %40 = vector.load %arg4[%39, %c0_12, %c0_13] : memref<8x8x128xbf16, #tpu.memory_space<vmem>>, vector<1x8x128xbf16>
    %41 = vector.shape_cast %40 : vector<1x8x128xbf16> to vector<8x128xbf16>
    %42 = vector.shape_cast %38 : vector<8x128xbf16> to vector<1x8x128xbf16>
    tpu.vector_store %arg4[%39, %c0_12, %c0_13], %42 {strides = array<i32>} : memref<8x8x128xbf16, #tpu.memory_space<vmem>>, vector<1x8x128xbf16>,
    %c8_i32 = arith.constant 8 : i32
    %43 = arith.muli %arg1, %c8_i32 : i32
    %44 = arith.addi %43, %c0_i32_4 : i32
    %c7_i32 = arith.constant 7 : i32
    %45 = arith.cmpi eq, %44, %c7_i32 : i32
    %46 = arith.extui %45 : i1 to i32
    %c0_i32_14 = arith.constant 0 : i32
    %47 = arith.cmpi ne, %46, %c0_i32_14 : i32
    scf.if %47 {
      %c0_112 = arith.constant 0 : index
      %c0_113 = arith.constant 0 : index
      %351 = vector.load %arg5[%c0_112, %c0_113] : memref<8x128xf32, #tpu.memory_space<vmem>>, vector<8x128xf32>
      tpu.vector_store %arg5[%c0_112, %c0_113], %37 {strides = array<i32>} : memref<8x128xf32, #tpu.memory_space<vmem>>, vector<8x128xf32>,
      %c0_114 = arith.constant 0 : index
      %c0_115 = arith.constant 0 : index
      %352 = vector.load %arg6[%c0_114, %c0_115] : memref<8x128xf32, #tpu.memory_space<vmem>>, vector<8x128xf32>
      tpu.vector_store %arg6[%c0_114, %c0_115], %35 {strides = array<i32>} : memref<8x128xf32, #tpu.memory_space<vmem>>, vector<8x128xf32>,
    } else {
    }
    %c1_i32 = arith.constant 1 : i32
    %48 = arith.index_cast %c1_i32 : i32 to index
    %c0_15 = arith.constant 0 : index
    %c0_16 = arith.constant 0 : index
    %49 = vector.load %arg2[%48, %c0_15, %c0_16] : memref<8x8x512xbf16, #tpu.memory_space<vmem>>, vector<1x8x512xbf16>
    %50 = vector.shape_cast %49 : vector<1x8x512xbf16> to vector<8x512xbf16>
    %51 = arith.extf %50 : vector<8x512xbf16> to vector<8x512xf32>
    %52 = arith.truncf %37 : vector<8x128xf32> to vector<8x128xbf16>
    %c0_17 = arith.constant 0 : index
    %c0_18 = arith.constant 0 : index
    %53 = vector.load %arg3[%c0_17, %c0_18] : memref<128x512xbf16, #tpu.memory_space<vmem>>, vector<128x512xbf16>
    %cst_19 = arith.constant dense<0.000000e+00> : vector<8x512xf32>
    %54 = tpu.matmul %52, %53, %cst_19 {dimension_numbers = #tpu.dot_dimension_numbers<[1], [0], [0], [1], [0, 0, 1, 1], [], []>} : vector<8x128xbf16>, vector<128x512xbf16>, vector<8x512xf32> -> vector<8x512xf32>
    %55 = arith.addf %51, %54 : vector<8x512xf32>
    %56 = vector.extract_strided_slice %55 {offsets = [0, 0], sizes = [8, 128], strides = [1, 1]} : vector<8x512xf32> to vector<8x128xf32>
    %57 = arith.negf %56 : vector<8x128xf32>
    %58 = math.exp %57 : vector<8x128xf32>
    %cst_20 = arith.constant 1.000000e+00 : f32
    %59 = vector.broadcast %cst_20 : f32 to vector<8x128xf32>
    %60 = arith.addf %59, %58 : vector<8x128xf32>
    %61 = arith.divf %59, %60 : vector<8x128xf32>
    %62 = vector.extract_strided_slice %55 {offsets = [0, 128], sizes = [8, 128], strides = [1, 1]} : vector<8x512xf32> to vector<8x128xf32>
    %63 = arith.negf %62 : vector<8x128xf32>
    %64 = math.exp %63 : vector<8x128xf32>
    %cst_21 = arith.constant 1.000000e+00 : f32
    %65 = vector.broadcast %cst_21 : f32 to vector<8x128xf32>
    %66 = arith.addf %65, %64 : vector<8x128xf32>
    %67 = arith.divf %65, %66 : vector<8x128xf32>
    %68 = vector.extract_strided_slice %55 {offsets = [0, 256], sizes = [8, 128], strides = [1, 1]} : vector<8x512xf32> to vector<8x128xf32>
    %69 = math.tanh %68 : vector<8x128xf32>
    %70 = vector.extract_strided_slice %55 {offsets = [0, 384], sizes = [8, 128], strides = [1, 1]} : vector<8x512xf32> to vector<8x128xf32>
    %71 = arith.negf %70 : vector<8x128xf32>
    %72 = math.exp %71 : vector<8x128xf32>
    %cst_22 = arith.constant 1.000000e+00 : f32
    %73 = vector.broadcast %cst_22 : f32 to vector<8x128xf32>
    %74 = arith.addf %73, %72 : vector<8x128xf32>
    %75 = arith.divf %73, %74 : vector<8x128xf32>
    %76 = arith.mulf %67, %35 : vector<8x128xf32>
    %77 = arith.mulf %61, %69 : vector<8x128xf32>
    %78 = arith.addf %76, %77 : vector<8x128xf32>
    %79 = math.tanh %78 : vector<8x128xf32>
    %80 = arith.mulf %75, %79 : vector<8x128xf32>
    %81 = arith.truncf %80 : vector<8x128xf32> to vector<8x128xbf16>
    %82 = arith.index_cast %c1_i32 : i32 to index
    %c0_23 = arith.constant 0 : index
    %c0_24 = arith.constant 0 : index
    %83 = vector.load %arg4[%82, %c0_23, %c0_24] : memref<8x8x128xbf16, #tpu.memory_space<vmem>>, vector<1x8x128xbf16>
    %84 = vector.shape_cast %83 : vector<1x8x128xbf16> to vector<8x128xbf16>
    %85 = vector.shape_cast %81 : vector<8x128xbf16> to vector<1x8x128xbf16>
    tpu.vector_store %arg4[%82, %c0_23, %c0_24], %85 {strides = array<i32>} : memref<8x8x128xbf16, #tpu.memory_space<vmem>>, vector<1x8x128xbf16>,
    %c8_i32_25 = arith.constant 8 : i32
    %86 = arith.muli %arg1, %c8_i32_25 : i32
    %87 = arith.addi %86, %c1_i32 : i32
    %c7_i32_26 = arith.constant 7 : i32
    %88 = arith.cmpi eq, %87, %c7_i32_26 : i32
    %89 = arith.extui %88 : i1 to i32
    %c0_i32_27 = arith.constant 0 : i32
    %90 = arith.cmpi ne, %89, %c0_i32_27 : i32
    scf.if %90 {
      %c0_112 = arith.constant 0 : index
      %c0_113 = arith.constant 0 : index
      %351 = vector.load %arg5[%c0_112, %c0_113] : memref<8x128xf32, #tpu.memory_space<vmem>>, vector<8x128xf32>
      tpu.vector_store %arg5[%c0_112, %c0_113], %80 {strides = array<i32>} : memref<8x128xf32, #tpu.memory_space<vmem>>, vector<8x128xf32>,
      %c0_114 = arith.constant 0 : index
      %c0_115 = arith.constant 0 : index
      %352 = vector.load %arg6[%c0_114, %c0_115] : memref<8x128xf32, #tpu.memory_space<vmem>>, vector<8x128xf32>
      tpu.vector_store %arg6[%c0_114, %c0_115], %78 {strides = array<i32>} : memref<8x128xf32, #tpu.memory_space<vmem>>, vector<8x128xf32>,
    } else {
    }
    %c2_i32 = arith.constant 2 : i32
    %91 = arith.index_cast %c2_i32 : i32 to index
    %c0_28 = arith.constant 0 : index
    %c0_29 = arith.constant 0 : index
    %92 = vector.load %arg2[%91, %c0_28, %c0_29] : memref<8x8x512xbf16, #tpu.memory_space<vmem>>, vector<1x8x512xbf16>
    %93 = vector.shape_cast %92 : vector<1x8x512xbf16> to vector<8x512xbf16>
    %94 = arith.extf %93 : vector<8x512xbf16> to vector<8x512xf32>
    %95 = arith.truncf %80 : vector<8x128xf32> to vector<8x128xbf16>
    %c0_30 = arith.constant 0 : index
    %c0_31 = arith.constant 0 : index
    %96 = vector.load %arg3[%c0_30, %c0_31] : memref<128x512xbf16, #tpu.memory_space<vmem>>, vector<128x512xbf16>
    %cst_32 = arith.constant dense<0.000000e+00> : vector<8x512xf32>
    %97 = tpu.matmul %95, %96, %cst_32 {dimension_numbers = #tpu.dot_dimension_numbers<[1], [0], [0], [1], [0, 0, 1, 1], [], []>} : vector<8x128xbf16>, vector<128x512xbf16>, vector<8x512xf32> -> vector<8x512xf32>
    %98 = arith.addf %94, %97 : vector<8x512xf32>
    %99 = vector.extract_strided_slice %98 {offsets = [0, 0], sizes = [8, 128], strides = [1, 1]} : vector<8x512xf32> to vector<8x128xf32>
    %100 = arith.negf %99 : vector<8x128xf32>
    %101 = math.exp %100 : vector<8x128xf32>
    %cst_33 = arith.constant 1.000000e+00 : f32
    %102 = vector.broadcast %cst_33 : f32 to vector<8x128xf32>
    %103 = arith.addf %102, %101 : vector<8x128xf32>
    %104 = arith.divf %102, %103 : vector<8x128xf32>
    %105 = vector.extract_strided_slice %98 {offsets = [0, 128], sizes = [8, 128], strides = [1, 1]} : vector<8x512xf32> to vector<8x128xf32>
    %106 = arith.negf %105 : vector<8x128xf32>
    %107 = math.exp %106 : vector<8x128xf32>
    %cst_34 = arith.constant 1.000000e+00 : f32
    %108 = vector.broadcast %cst_34 : f32 to vector<8x128xf32>
    %109 = arith.addf %108, %107 : vector<8x128xf32>
    %110 = arith.divf %108, %109 : vector<8x128xf32>
    %111 = vector.extract_strided_slice %98 {offsets = [0, 256], sizes = [8, 128], strides = [1, 1]} : vector<8x512xf32> to vector<8x128xf32>
    %112 = math.tanh %111 : vector<8x128xf32>
    %113 = vector.extract_strided_slice %98 {offsets = [0, 384], sizes = [8, 128], strides = [1, 1]} : vector<8x512xf32> to vector<8x128xf32>
    %114 = arith.negf %113 : vector<8x128xf32>
    %115 = math.exp %114 : vector<8x128xf32>
    %cst_35 = arith.constant 1.000000e+00 : f32
    %116 = vector.broadcast %cst_35 : f32 to vector<8x128xf32>
    %117 = arith.addf %116, %115 : vector<8x128xf32>
    %118 = arith.divf %116, %117 : vector<8x128xf32>
    %119 = arith.mulf %110, %78 : vector<8x128xf32>
    %120 = arith.mulf %104, %112 : vector<8x128xf32>
    %121 = arith.addf %119, %120 : vector<8x128xf32>
    %122 = math.tanh %121 : vector<8x128xf32>
    %123 = arith.mulf %118, %122 : vector<8x128xf32>
    %124 = arith.truncf %123 : vector<8x128xf32> to vector<8x128xbf16>
    %125 = arith.index_cast %c2_i32 : i32 to index
    %c0_36 = arith.constant 0 : index
    %c0_37 = arith.constant 0 : index
    %126 = vector.load %arg4[%125, %c0_36, %c0_37] : memref<8x8x128xbf16, #tpu.memory_space<vmem>>, vector<1x8x128xbf16>
    %127 = vector.shape_cast %126 : vector<1x8x128xbf16> to vector<8x128xbf16>
    %128 = vector.shape_cast %124 : vector<8x128xbf16> to vector<1x8x128xbf16>
    tpu.vector_store %arg4[%125, %c0_36, %c0_37], %128 {strides = array<i32>} : memref<8x8x128xbf16, #tpu.memory_space<vmem>>, vector<1x8x128xbf16>,
    %c8_i32_38 = arith.constant 8 : i32
    %129 = arith.muli %arg1, %c8_i32_38 : i32
    %130 = arith.addi %129, %c2_i32 : i32
    %c7_i32_39 = arith.constant 7 : i32
    %131 = arith.cmpi eq, %130, %c7_i32_39 : i32
    %132 = arith.extui %131 : i1 to i32
    %c0_i32_40 = arith.constant 0 : i32
    %133 = arith.cmpi ne, %132, %c0_i32_40 : i32
    scf.if %133 {
      %c0_112 = arith.constant 0 : index
      %c0_113 = arith.constant 0 : index
      %351 = vector.load %arg5[%c0_112, %c0_113] : memref<8x128xf32, #tpu.memory_space<vmem>>, vector<8x128xf32>
      tpu.vector_store %arg5[%c0_112, %c0_113], %123 {strides = array<i32>} : memref<8x128xf32, #tpu.memory_space<vmem>>, vector<8x128xf32>,
      %c0_114 = arith.constant 0 : index
      %c0_115 = arith.constant 0 : index
      %352 = vector.load %arg6[%c0_114, %c0_115] : memref<8x128xf32, #tpu.memory_space<vmem>>, vector<8x128xf32>
      tpu.vector_store %arg6[%c0_114, %c0_115], %121 {strides = array<i32>} : memref<8x128xf32, #tpu.memory_space<vmem>>, vector<8x128xf32>,
    } else {
    }
    %c3_i32 = arith.constant 3 : i32
    %134 = arith.index_cast %c3_i32 : i32 to index
    %c0_41 = arith.constant 0 : index
    %c0_42 = arith.constant 0 : index
    %135 = vector.load %arg2[%134, %c0_41, %c0_42] : memref<8x8x512xbf16, #tpu.memory_space<vmem>>, vector<1x8x512xbf16>
    %136 = vector.shape_cast %135 : vector<1x8x512xbf16> to vector<8x512xbf16>
    %137 = arith.extf %136 : vector<8x512xbf16> to vector<8x512xf32>
    %138 = arith.truncf %123 : vector<8x128xf32> to vector<8x128xbf16>
    %c0_43 = arith.constant 0 : index
    %c0_44 = arith.constant 0 : index
    %139 = vector.load %arg3[%c0_43, %c0_44] : memref<128x512xbf16, #tpu.memory_space<vmem>>, vector<128x512xbf16>
    %cst_45 = arith.constant dense<0.000000e+00> : vector<8x512xf32>
    %140 = tpu.matmul %138, %139, %cst_45 {dimension_numbers = #tpu.dot_dimension_numbers<[1], [0], [0], [1], [0, 0, 1, 1], [], []>} : vector<8x128xbf16>, vector<128x512xbf16>, vector<8x512xf32> -> vector<8x512xf32>
    %141 = arith.addf %137, %140 : vector<8x512xf32>
    %142 = vector.extract_strided_slice %141 {offsets = [0, 0], sizes = [8, 128], strides = [1, 1]} : vector<8x512xf32> to vector<8x128xf32>
    %143 = arith.negf %142 : vector<8x128xf32>
    %144 = math.exp %143 : vector<8x128xf32>
    %cst_46 = arith.constant 1.000000e+00 : f32
    %145 = vector.broadcast %cst_46 : f32 to vector<8x128xf32>
    %146 = arith.addf %145, %144 : vector<8x128xf32>
    %147 = arith.divf %145, %146 : vector<8x128xf32>
    %148 = vector.extract_strided_slice %141 {offsets = [0, 128], sizes = [8, 128], strides = [1, 1]} : vector<8x512xf32> to vector<8x128xf32>
    %149 = arith.negf %148 : vector<8x128xf32>
    %150 = math.exp %149 : vector<8x128xf32>
    %cst_47 = arith.constant 1.000000e+00 : f32
    %151 = vector.broadcast %cst_47 : f32 to vector<8x128xf32>
    %152 = arith.addf %151, %150 : vector<8x128xf32>
    %153 = arith.divf %151, %152 : vector<8x128xf32>
    %154 = vector.extract_strided_slice %141 {offsets = [0, 256], sizes = [8, 128], strides = [1, 1]} : vector<8x512xf32> to vector<8x128xf32>
    %155 = math.tanh %154 : vector<8x128xf32>
    %156 = vector.extract_strided_slice %141 {offsets = [0, 384], sizes = [8, 128], strides = [1, 1]} : vector<8x512xf32> to vector<8x128xf32>
    %157 = arith.negf %156 : vector<8x128xf32>
    %158 = math.exp %157 : vector<8x128xf32>
    %cst_48 = arith.constant 1.000000e+00 : f32
    %159 = vector.broadcast %cst_48 : f32 to vector<8x128xf32>
    %160 = arith.addf %159, %158 : vector<8x128xf32>
    %161 = arith.divf %159, %160 : vector<8x128xf32>
    %162 = arith.mulf %153, %121 : vector<8x128xf32>
    %163 = arith.mulf %147, %155 : vector<8x128xf32>
    %164 = arith.addf %162, %163 : vector<8x128xf32>
    %165 = math.tanh %164 : vector<8x128xf32>
    %166 = arith.mulf %161, %165 : vector<8x128xf32>
    %167 = arith.truncf %166 : vector<8x128xf32> to vector<8x128xbf16>
    %168 = arith.index_cast %c3_i32 : i32 to index
    %c0_49 = arith.constant 0 : index
    %c0_50 = arith.constant 0 : index
    %169 = vector.load %arg4[%168, %c0_49, %c0_50] : memref<8x8x128xbf16, #tpu.memory_space<vmem>>, vector<1x8x128xbf16>
    %170 = vector.shape_cast %169 : vector<1x8x128xbf16> to vector<8x128xbf16>
    %171 = vector.shape_cast %167 : vector<8x128xbf16> to vector<1x8x128xbf16>
    tpu.vector_store %arg4[%168, %c0_49, %c0_50], %171 {strides = array<i32>} : memref<8x8x128xbf16, #tpu.memory_space<vmem>>, vector<1x8x128xbf16>,
    %c8_i32_51 = arith.constant 8 : i32
    %172 = arith.muli %arg1, %c8_i32_51 : i32
    %173 = arith.addi %172, %c3_i32 : i32
    %c7_i32_52 = arith.constant 7 : i32
    %174 = arith.cmpi eq, %173, %c7_i32_52 : i32
    %175 = arith.extui %174 : i1 to i32
    %c0_i32_53 = arith.constant 0 : i32
    %176 = arith.cmpi ne, %175, %c0_i32_53 : i32
    scf.if %176 {
      %c0_112 = arith.constant 0 : index
      %c0_113 = arith.constant 0 : index
      %351 = vector.load %arg5[%c0_112, %c0_113] : memref<8x128xf32, #tpu.memory_space<vmem>>, vector<8x128xf32>
      tpu.vector_store %arg5[%c0_112, %c0_113], %166 {strides = array<i32>} : memref<8x128xf32, #tpu.memory_space<vmem>>, vector<8x128xf32>,
      %c0_114 = arith.constant 0 : index
      %c0_115 = arith.constant 0 : index
      %352 = vector.load %arg6[%c0_114, %c0_115] : memref<8x128xf32, #tpu.memory_space<vmem>>, vector<8x128xf32>
      tpu.vector_store %arg6[%c0_114, %c0_115], %164 {strides = array<i32>} : memref<8x128xf32, #tpu.memory_space<vmem>>, vector<8x128xf32>,
    } else {
    }
    %c4_i32 = arith.constant 4 : i32
    %177 = arith.index_cast %c4_i32 : i32 to index
    %c0_54 = arith.constant 0 : index
    %c0_55 = arith.constant 0 : index
    %178 = vector.load %arg2[%177, %c0_54, %c0_55] : memref<8x8x512xbf16, #tpu.memory_space<vmem>>, vector<1x8x512xbf16>
    %179 = vector.shape_cast %178 : vector<1x8x512xbf16> to vector<8x512xbf16>
    %180 = arith.extf %179 : vector<8x512xbf16> to vector<8x512xf32>
    %181 = arith.truncf %166 : vector<8x128xf32> to vector<8x128xbf16>
    %c0_56 = arith.constant 0 : index
    %c0_57 = arith.constant 0 : index
    %182 = vector.load %arg3[%c0_56, %c0_57] : memref<128x512xbf16, #tpu.memory_space<vmem>>, vector<128x512xbf16>
    %cst_58 = arith.constant dense<0.000000e+00> : vector<8x512xf32>
    %183 = tpu.matmul %181, %182, %cst_58 {dimension_numbers = #tpu.dot_dimension_numbers<[1], [0], [0], [1], [0, 0, 1, 1], [], []>} : vector<8x128xbf16>, vector<128x512xbf16>, vector<8x512xf32> -> vector<8x512xf32>
    %184 = arith.addf %180, %183 : vector<8x512xf32>
    %185 = vector.extract_strided_slice %184 {offsets = [0, 0], sizes = [8, 128], strides = [1, 1]} : vector<8x512xf32> to vector<8x128xf32>
    %186 = arith.negf %185 : vector<8x128xf32>
    %187 = math.exp %186 : vector<8x128xf32>
    %cst_59 = arith.constant 1.000000e+00 : f32
    %188 = vector.broadcast %cst_59 : f32 to vector<8x128xf32>
    %189 = arith.addf %188, %187 : vector<8x128xf32>
    %190 = arith.divf %188, %189 : vector<8x128xf32>
    %191 = vector.extract_strided_slice %184 {offsets = [0, 128], sizes = [8, 128], strides = [1, 1]} : vector<8x512xf32> to vector<8x128xf32>
    %192 = arith.negf %191 : vector<8x128xf32>
    %193 = math.exp %192 : vector<8x128xf32>
    %cst_60 = arith.constant 1.000000e+00 : f32
    %194 = vector.broadcast %cst_60 : f32 to vector<8x128xf32>
    %195 = arith.addf %194, %193 : vector<8x128xf32>
    %196 = arith.divf %194, %195 : vector<8x128xf32>
    %197 = vector.extract_strided_slice %184 {offsets = [0, 256], sizes = [8, 128], strides = [1, 1]} : vector<8x512xf32> to vector<8x128xf32>
    %198 = math.tanh %197 : vector<8x128xf32>
    %199 = vector.extract_strided_slice %184 {offsets = [0, 384], sizes = [8, 128], strides = [1, 1]} : vector<8x512xf32> to vector<8x128xf32>
    %200 = arith.negf %199 : vector<8x128xf32>
    %201 = math.exp %200 : vector<8x128xf32>
    %cst_61 = arith.constant 1.000000e+00 : f32
    %202 = vector.broadcast %cst_61 : f32 to vector<8x128xf32>
    %203 = arith.addf %202, %201 : vector<8x128xf32>
    %204 = arith.divf %202, %203 : vector<8x128xf32>
    %205 = arith.mulf %196, %164 : vector<8x128xf32>
    %206 = arith.mulf %190, %198 : vector<8x128xf32>
    %207 = arith.addf %205, %206 : vector<8x128xf32>
    %208 = math.tanh %207 : vector<8x128xf32>
    %209 = arith.mulf %204, %208 : vector<8x128xf32>
    %210 = arith.truncf %209 : vector<8x128xf32> to vector<8x128xbf16>
    %211 = arith.index_cast %c4_i32 : i32 to index
    %c0_62 = arith.constant 0 : index
    %c0_63 = arith.constant 0 : index
    %212 = vector.load %arg4[%211, %c0_62, %c0_63] : memref<8x8x128xbf16, #tpu.memory_space<vmem>>, vector<1x8x128xbf16>
    %213 = vector.shape_cast %212 : vector<1x8x128xbf16> to vector<8x128xbf16>
    %214 = vector.shape_cast %210 : vector<8x128xbf16> to vector<1x8x128xbf16>
    tpu.vector_store %arg4[%211, %c0_62, %c0_63], %214 {strides = array<i32>} : memref<8x8x128xbf16, #tpu.memory_space<vmem>>, vector<1x8x128xbf16>,
    %c8_i32_64 = arith.constant 8 : i32
    %215 = arith.muli %arg1, %c8_i32_64 : i32
    %216 = arith.addi %215, %c4_i32 : i32
    %c7_i32_65 = arith.constant 7 : i32
    %217 = arith.cmpi eq, %216, %c7_i32_65 : i32
    %218 = arith.extui %217 : i1 to i32
    %c0_i32_66 = arith.constant 0 : i32
    %219 = arith.cmpi ne, %218, %c0_i32_66 : i32
    scf.if %219 {
      %c0_112 = arith.constant 0 : index
      %c0_113 = arith.constant 0 : index
      %351 = vector.load %arg5[%c0_112, %c0_113] : memref<8x128xf32, #tpu.memory_space<vmem>>, vector<8x128xf32>
      tpu.vector_store %arg5[%c0_112, %c0_113], %209 {strides = array<i32>} : memref<8x128xf32, #tpu.memory_space<vmem>>, vector<8x128xf32>,
      %c0_114 = arith.constant 0 : index
      %c0_115 = arith.constant 0 : index
      %352 = vector.load %arg6[%c0_114, %c0_115] : memref<8x128xf32, #tpu.memory_space<vmem>>, vector<8x128xf32>
      tpu.vector_store %arg6[%c0_114, %c0_115], %207 {strides = array<i32>} : memref<8x128xf32, #tpu.memory_space<vmem>>, vector<8x128xf32>,
    } else {
    }
    %c5_i32 = arith.constant 5 : i32
    %220 = arith.index_cast %c5_i32 : i32 to index
    %c0_67 = arith.constant 0 : index
    %c0_68 = arith.constant 0 : index
    %221 = vector.load %arg2[%220, %c0_67, %c0_68] : memref<8x8x512xbf16, #tpu.memory_space<vmem>>, vector<1x8x512xbf16>
    %222 = vector.shape_cast %221 : vector<1x8x512xbf16> to vector<8x512xbf16>
    %223 = arith.extf %222 : vector<8x512xbf16> to vector<8x512xf32>
    %224 = arith.truncf %209 : vector<8x128xf32> to vector<8x128xbf16>
    %c0_69 = arith.constant 0 : index
    %c0_70 = arith.constant 0 : index
    %225 = vector.load %arg3[%c0_69, %c0_70] : memref<128x512xbf16, #tpu.memory_space<vmem>>, vector<128x512xbf16>
    %cst_71 = arith.constant dense<0.000000e+00> : vector<8x512xf32>
    %226 = tpu.matmul %224, %225, %cst_71 {dimension_numbers = #tpu.dot_dimension_numbers<[1], [0], [0], [1], [0, 0, 1, 1], [], []>} : vector<8x128xbf16>, vector<128x512xbf16>, vector<8x512xf32> -> vector<8x512xf32>
    %227 = arith.addf %223, %226 : vector<8x512xf32>
    %228 = vector.extract_strided_slice %227 {offsets = [0, 0], sizes = [8, 128], strides = [1, 1]} : vector<8x512xf32> to vector<8x128xf32>
    %229 = arith.negf %228 : vector<8x128xf32>
    %230 = math.exp %229 : vector<8x128xf32>
    %cst_72 = arith.constant 1.000000e+00 : f32
    %231 = vector.broadcast %cst_72 : f32 to vector<8x128xf32>
    %232 = arith.addf %231, %230 : vector<8x128xf32>
    %233 = arith.divf %231, %232 : vector<8x128xf32>
    %234 = vector.extract_strided_slice %227 {offsets = [0, 128], sizes = [8, 128], strides = [1, 1]} : vector<8x512xf32> to vector<8x128xf32>
    %235 = arith.negf %234 : vector<8x128xf32>
    %236 = math.exp %235 : vector<8x128xf32>
    %cst_73 = arith.constant 1.000000e+00 : f32
    %237 = vector.broadcast %cst_73 : f32 to vector<8x128xf32>
    %238 = arith.addf %237, %236 : vector<8x128xf32>
    %239 = arith.divf %237, %238 : vector<8x128xf32>
    %240 = vector.extract_strided_slice %227 {offsets = [0, 256], sizes = [8, 128], strides = [1, 1]} : vector<8x512xf32> to vector<8x128xf32>
    %241 = math.tanh %240 : vector<8x128xf32>
    %242 = vector.extract_strided_slice %227 {offsets = [0, 384], sizes = [8, 128], strides = [1, 1]} : vector<8x512xf32> to vector<8x128xf32>
    %243 = arith.negf %242 : vector<8x128xf32>
    %244 = math.exp %243 : vector<8x128xf32>
    %cst_74 = arith.constant 1.000000e+00 : f32
    %245 = vector.broadcast %cst_74 : f32 to vector<8x128xf32>
    %246 = arith.addf %245, %244 : vector<8x128xf32>
    %247 = arith.divf %245, %246 : vector<8x128xf32>
    %248 = arith.mulf %239, %207 : vector<8x128xf32>
    %249 = arith.mulf %233, %241 : vector<8x128xf32>
    %250 = arith.addf %248, %249 : vector<8x128xf32>
    %251 = math.tanh %250 : vector<8x128xf32>
    %252 = arith.mulf %247, %251 : vector<8x128xf32>
    %253 = arith.truncf %252 : vector<8x128xf32> to vector<8x128xbf16>
    %254 = arith.index_cast %c5_i32 : i32 to index
    %c0_75 = arith.constant 0 : index
    %c0_76 = arith.constant 0 : index
    %255 = vector.load %arg4[%254, %c0_75, %c0_76] : memref<8x8x128xbf16, #tpu.memory_space<vmem>>, vector<1x8x128xbf16>
    %256 = vector.shape_cast %255 : vector<1x8x128xbf16> to vector<8x128xbf16>
    %257 = vector.shape_cast %253 : vector<8x128xbf16> to vector<1x8x128xbf16>
    tpu.vector_store %arg4[%254, %c0_75, %c0_76], %257 {strides = array<i32>} : memref<8x8x128xbf16, #tpu.memory_space<vmem>>, vector<1x8x128xbf16>,
    %c8_i32_77 = arith.constant 8 : i32
    %258 = arith.muli %arg1, %c8_i32_77 : i32
    %259 = arith.addi %258, %c5_i32 : i32
    %c7_i32_78 = arith.constant 7 : i32
    %260 = arith.cmpi eq, %259, %c7_i32_78 : i32
    %261 = arith.extui %260 : i1 to i32
    %c0_i32_79 = arith.constant 0 : i32
    %262 = arith.cmpi ne, %261, %c0_i32_79 : i32
    scf.if %262 {
      %c0_112 = arith.constant 0 : index
      %c0_113 = arith.constant 0 : index
      %351 = vector.load %arg5[%c0_112, %c0_113] : memref<8x128xf32, #tpu.memory_space<vmem>>, vector<8x128xf32>
      tpu.vector_store %arg5[%c0_112, %c0_113], %252 {strides = array<i32>} : memref<8x128xf32, #tpu.memory_space<vmem>>, vector<8x128xf32>,
      %c0_114 = arith.constant 0 : index
      %c0_115 = arith.constant 0 : index
      %352 = vector.load %arg6[%c0_114, %c0_115] : memref<8x128xf32, #tpu.memory_space<vmem>>, vector<8x128xf32>
      tpu.vector_store %arg6[%c0_114, %c0_115], %250 {strides = array<i32>} : memref<8x128xf32, #tpu.memory_space<vmem>>, vector<8x128xf32>,
    } else {
    }
    %c6_i32 = arith.constant 6 : i32
    %263 = arith.index_cast %c6_i32 : i32 to index
    %c0_80 = arith.constant 0 : index
    %c0_81 = arith.constant 0 : index
    %264 = vector.load %arg2[%263, %c0_80, %c0_81] : memref<8x8x512xbf16, #tpu.memory_space<vmem>>, vector<1x8x512xbf16>
    %265 = vector.shape_cast %264 : vector<1x8x512xbf16> to vector<8x512xbf16>
    %266 = arith.extf %265 : vector<8x512xbf16> to vector<8x512xf32>
    %267 = arith.truncf %252 : vector<8x128xf32> to vector<8x128xbf16>
    %c0_82 = arith.constant 0 : index
    %c0_83 = arith.constant 0 : index
    %268 = vector.load %arg3[%c0_82, %c0_83] : memref<128x512xbf16, #tpu.memory_space<vmem>>, vector<128x512xbf16>
    %cst_84 = arith.constant dense<0.000000e+00> : vector<8x512xf32>
    %269 = tpu.matmul %267, %268, %cst_84 {dimension_numbers = #tpu.dot_dimension_numbers<[1], [0], [0], [1], [0, 0, 1, 1], [], []>} : vector<8x128xbf16>, vector<128x512xbf16>, vector<8x512xf32> -> vector<8x512xf32>
    %270 = arith.addf %266, %269 : vector<8x512xf32>
    %271 = vector.extract_strided_slice %270 {offsets = [0, 0], sizes = [8, 128], strides = [1, 1]} : vector<8x512xf32> to vector<8x128xf32>
    %272 = arith.negf %271 : vector<8x128xf32>
    %273 = math.exp %272 : vector<8x128xf32>
    %cst_85 = arith.constant 1.000000e+00 : f32
    %274 = vector.broadcast %cst_85 : f32 to vector<8x128xf32>
    %275 = arith.addf %274, %273 : vector<8x128xf32>
    %276 = arith.divf %274, %275 : vector<8x128xf32>
    %277 = vector.extract_strided_slice %270 {offsets = [0, 128], sizes = [8, 128], strides = [1, 1]} : vector<8x512xf32> to vector<8x128xf32>
    %278 = arith.negf %277 : vector<8x128xf32>
    %279 = math.exp %278 : vector<8x128xf32>
    %cst_86 = arith.constant 1.000000e+00 : f32
    %280 = vector.broadcast %cst_86 : f32 to vector<8x128xf32>
    %281 = arith.addf %280, %279 : vector<8x128xf32>
    %282 = arith.divf %280, %281 : vector<8x128xf32>
    %283 = vector.extract_strided_slice %270 {offsets = [0, 256], sizes = [8, 128], strides = [1, 1]} : vector<8x512xf32> to vector<8x128xf32>
    %284 = math.tanh %283 : vector<8x128xf32>
    %285 = vector.extract_strided_slice %270 {offsets = [0, 384], sizes = [8, 128], strides = [1, 1]} : vector<8x512xf32> to vector<8x128xf32>
    %286 = arith.negf %285 : vector<8x128xf32>
    %287 = math.exp %286 : vector<8x128xf32>
    %cst_87 = arith.constant 1.000000e+00 : f32
    %288 = vector.broadcast %cst_87 : f32 to vector<8x128xf32>
    %289 = arith.addf %288, %287 : vector<8x128xf32>
    %290 = arith.divf %288, %289 : vector<8x128xf32>
    %291 = arith.mulf %282, %250 : vector<8x128xf32>
    %292 = arith.mulf %276, %284 : vector<8x128xf32>
    %293 = arith.addf %291, %292 : vector<8x128xf32>
    %294 = math.tanh %293 : vector<8x128xf32>
    %295 = arith.mulf %290, %294 : vector<8x128xf32>
    %296 = arith.truncf %295 : vector<8x128xf32> to vector<8x128xbf16>
    %297 = arith.index_cast %c6_i32 : i32 to index
    %c0_88 = arith.constant 0 : index
    %c0_89 = arith.constant 0 : index
    %298 = vector.load %arg4[%297, %c0_88, %c0_89] : memref<8x8x128xbf16, #tpu.memory_space<vmem>>, vector<1x8x128xbf16>
    %299 = vector.shape_cast %298 : vector<1x8x128xbf16> to vector<8x128xbf16>
    %300 = vector.shape_cast %296 : vector<8x128xbf16> to vector<1x8x128xbf16>
    tpu.vector_store %arg4[%297, %c0_88, %c0_89], %300 {strides = array<i32>} : memref<8x8x128xbf16, #tpu.memory_space<vmem>>, vector<1x8x128xbf16>,
    %c8_i32_90 = arith.constant 8 : i32
    %301 = arith.muli %arg1, %c8_i32_90 : i32
    %302 = arith.addi %301, %c6_i32 : i32
    %c7_i32_91 = arith.constant 7 : i32
    %303 = arith.cmpi eq, %302, %c7_i32_91 : i32
    %304 = arith.extui %303 : i1 to i32
    %c0_i32_92 = arith.constant 0 : i32
    %305 = arith.cmpi ne, %304, %c0_i32_92 : i32
    scf.if %305 {
      %c0_112 = arith.constant 0 : index
      %c0_113 = arith.constant 0 : index
      %351 = vector.load %arg5[%c0_112, %c0_113] : memref<8x128xf32, #tpu.memory_space<vmem>>, vector<8x128xf32>
      tpu.vector_store %arg5[%c0_112, %c0_113], %295 {strides = array<i32>} : memref<8x128xf32, #tpu.memory_space<vmem>>, vector<8x128xf32>,
      %c0_114 = arith.constant 0 : index
      %c0_115 = arith.constant 0 : index
      %352 = vector.load %arg6[%c0_114, %c0_115] : memref<8x128xf32, #tpu.memory_space<vmem>>, vector<8x128xf32>
      tpu.vector_store %arg6[%c0_114, %c0_115], %293 {strides = array<i32>} : memref<8x128xf32, #tpu.memory_space<vmem>>, vector<8x128xf32>,
    } else {
    }
    %c7_i32_93 = arith.constant 7 : i32
    %306 = arith.index_cast %c7_i32_93 : i32 to index
    %c0_94 = arith.constant 0 : index
    %c0_95 = arith.constant 0 : index
    %307 = vector.load %arg2[%306, %c0_94, %c0_95] : memref<8x8x512xbf16, #tpu.memory_space<vmem>>, vector<1x8x512xbf16>
    %308 = vector.shape_cast %307 : vector<1x8x512xbf16> to vector<8x512xbf16>
    %309 = arith.extf %308 : vector<8x512xbf16> to vector<8x512xf32>
    %310 = arith.truncf %295 : vector<8x128xf32> to vector<8x128xbf16>
    %c0_96 = arith.constant 0 : index
    %c0_97 = arith.constant 0 : index
    %311 = vector.load %arg3[%c0_96, %c0_97] : memref<128x512xbf16, #tpu.memory_space<vmem>>, vector<128x512xbf16>
    %cst_98 = arith.constant dense<0.000000e+00> : vector<8x512xf32>
    %312 = tpu.matmul %310, %311, %cst_98 {dimension_numbers = #tpu.dot_dimension_numbers<[1], [0], [0], [1], [0, 0, 1, 1], [], []>} : vector<8x128xbf16>, vector<128x512xbf16>, vector<8x512xf32> -> vector<8x512xf32>
    %313 = arith.addf %309, %312 : vector<8x512xf32>
    %314 = vector.extract_strided_slice %313 {offsets = [0, 0], sizes = [8, 128], strides = [1, 1]} : vector<8x512xf32> to vector<8x128xf32>
    %315 = arith.negf %314 : vector<8x128xf32>
    %316 = math.exp %315 : vector<8x128xf32>
    %cst_99 = arith.constant 1.000000e+00 : f32
    %317 = vector.broadcast %cst_99 : f32 to vector<8x128xf32>
    %318 = arith.addf %317, %316 : vector<8x128xf32>
    %319 = arith.divf %317, %318 : vector<8x128xf32>
    %320 = vector.extract_strided_slice %313 {offsets = [0, 128], sizes = [8, 128], strides = [1, 1]} : vector<8x512xf32> to vector<8x128xf32>
    %321 = arith.negf %320 : vector<8x128xf32>
    %322 = math.exp %321 : vector<8x128xf32>
    %cst_100 = arith.constant 1.000000e+00 : f32
    %323 = vector.broadcast %cst_100 : f32 to vector<8x128xf32>
    %324 = arith.addf %323, %322 : vector<8x128xf32>
    %325 = arith.divf %323, %324 : vector<8x128xf32>
    %326 = vector.extract_strided_slice %313 {offsets = [0, 256], sizes = [8, 128], strides = [1, 1]} : vector<8x512xf32> to vector<8x128xf32>
    %327 = math.tanh %326 : vector<8x128xf32>
    %328 = vector.extract_strided_slice %313 {offsets = [0, 384], sizes = [8, 128], strides = [1, 1]} : vector<8x512xf32> to vector<8x128xf32>
    %329 = arith.negf %328 : vector<8x128xf32>
    %330 = math.exp %329 : vector<8x128xf32>
    %cst_101 = arith.constant 1.000000e+00 : f32
    %331 = vector.broadcast %cst_101 : f32 to vector<8x128xf32>
    %332 = arith.addf %331, %330 : vector<8x128xf32>
    %333 = arith.divf %331, %332 : vector<8x128xf32>
    %334 = arith.mulf %325, %293 : vector<8x128xf32>
    %335 = arith.mulf %319, %327 : vector<8x128xf32>
    %336 = arith.addf %334, %335 : vector<8x128xf32>
    %337 = math.tanh %336 : vector<8x128xf32>
    %338 = arith.mulf %333, %337 : vector<8x128xf32>
    %339 = arith.truncf %338 : vector<8x128xf32> to vector<8x128xbf16>
    %340 = arith.index_cast %c7_i32_93 : i32 to index
    %c0_102 = arith.constant 0 : index
    %c0_103 = arith.constant 0 : index
    %341 = vector.load %arg4[%340, %c0_102, %c0_103] : memref<8x8x128xbf16, #tpu.memory_space<vmem>>, vector<1x8x128xbf16>
    %342 = vector.shape_cast %341 : vector<1x8x128xbf16> to vector<8x128xbf16>
    %343 = vector.shape_cast %339 : vector<8x128xbf16> to vector<1x8x128xbf16>
    tpu.vector_store %arg4[%340, %c0_102, %c0_103], %343 {strides = array<i32>} : memref<8x8x128xbf16, #tpu.memory_space<vmem>>, vector<1x8x128xbf16>,
    %c8_i32_104 = arith.constant 8 : i32
    %344 = arith.muli %arg1, %c8_i32_104 : i32
    %345 = arith.addi %344, %c7_i32_93 : i32
    %c7_i32_105 = arith.constant 7 : i32
    %346 = arith.cmpi eq, %345, %c7_i32_105 : i32
    %347 = arith.extui %346 : i1 to i32
    %c0_i32_106 = arith.constant 0 : i32
    %348 = arith.cmpi ne, %347, %c0_i32_106 : i32
    scf.if %348 {
      %c0_112 = arith.constant 0 : index
      %c0_113 = arith.constant 0 : index
      %351 = vector.load %arg5[%c0_112, %c0_113] : memref<8x128xf32, #tpu.memory_space<vmem>>, vector<8x128xf32>
      tpu.vector_store %arg5[%c0_112, %c0_113], %338 {strides = array<i32>} : memref<8x128xf32, #tpu.memory_space<vmem>>, vector<8x128xf32>,
      %c0_114 = arith.constant 0 : index
      %c0_115 = arith.constant 0 : index
      %352 = vector.load %arg6[%c0_114, %c0_115] : memref<8x128xf32, #tpu.memory_space<vmem>>, vector<8x128xf32>
      tpu.vector_store %arg6[%c0_114, %c0_115], %336 {strides = array<i32>} : memref<8x128xf32, #tpu.memory_space<vmem>>, vector<8x128xf32>,
    } else {
    }
    %c8_i32_107 = arith.constant 8 : i32
    %c0_108 = arith.constant 0 : index
    %c0_109 = arith.constant 0 : index
    %349 = vector.load %arg7[%c0_108, %c0_109] : memref<8x128xf32, #tpu.memory_space<vmem>>, vector<8x128xf32>
    tpu.vector_store %arg7[%c0_108, %c0_109], %338 {strides = array<i32>} : memref<8x128xf32, #tpu.memory_space<vmem>>, vector<8x128xf32>,
    %c0_110 = arith.constant 0 : index
    %c0_111 = arith.constant 0 : index
    %350 = vector.load %arg8[%c0_110, %c0_111] : memref<8x128xf32, #tpu.memory_space<vmem>>, vector<8x128xf32>
    tpu.vector_store %arg8[%c0_110, %c0_111], %336 {strides = array<i32>} : memref<8x128xf32, #tpu.memory_space<vmem>>, vector<8x128xf32>,
    return
  }
  func.func @transform_0(%arg0: i32, %arg1: i32) -> (i32, i32, i32) {
    %c0_i32 = arith.constant 0 : i32
    %c0_i32_0 = arith.constant 0 : i32
    return %arg1, %arg0, %c0_i32 : i32, i32, i32
  }
  func.func @transform_1(%arg0: i32, %arg1: i32) -> (i32, i32) {
    %c0_i32 = arith.constant 0 : i32
    %c0_i32_0 = arith.constant 0 : i32
    %c0_i32_1 = arith.constant 0 : i32
    return %c0_i32, %c0_i32_0 : i32, i32
  }
  func.func @transform_2(%arg0: i32, %arg1: i32) -> (i32, i32, i32) {
    %c0_i32 = arith.constant 0 : i32
    %c0_i32_0 = arith.constant 0 : i32
    return %arg1, %arg0, %c0_i32 : i32, i32, i32
  }
  func.func @transform_3(%arg0: i32, %arg1: i32) -> (i32, i32) {
    %c0_i32 = arith.constant 0 : i32
    %c0_i32_0 = arith.constant 0 : i32
    return %arg0, %c0_i32 : i32, i32
  }
  func.func @transform_4(%arg0: i32, %arg1: i32) -> (i32, i32) {
    %c0_i32 = arith.constant 0 : i32
    %c0_i32_0 = arith.constant 0 : i32
    return %arg0, %c0_i32 : i32, i32
  }
}

module attributes {stable_mosaic.version = 11 : i64} {
  func.func @_matmul_bias_kernel(%arg0: i32, %arg1: i32, %arg2: i32, %arg3: memref<64x128xbf16, #tpu.memory_space<vmem>>, %arg4: memref<128x512xbf16, #tpu.memory_space<vmem>>, %arg5: memref<1x512xf32, #tpu.memory_space<vmem>>, %arg6: memref<64x512xbf16, #tpu.memory_space<vmem>>, %arg7: memref<64x512xf32, #tpu.memory_space<vmem>>) attributes {dimension_semantics = [#tpu.dimension_semantics<parallel>, #tpu.dimension_semantics<parallel>, #tpu.dimension_semantics<arbitrary>], iteration_bounds = array<i64: 1, 1, 1>, scalar_prefetch = 0 : i64, scratch_operands = 1 : i64, tpu.core_type = #tpu.core_type<tc>, window_params = [{transform_indices = @transform_0, window_bounds = array<i64: 64, 128>}, {transform_indices = @transform_1, window_bounds = array<i64: 128, 512>}, {transform_indices = @transform_2, window_bounds = array<i64: 1, 512>}, {transform_indices = @transform_3, window_bounds = array<i64: 64, 512>}]} {
    %c0_i32 = arith.constant 0 : i32
    %0 = arith.cmpi eq, %arg2, %c0_i32 : i32
    %1 = arith.extui %0 : i1 to i32
    %c0_i32_0 = arith.constant 0 : i32
    %2 = arith.cmpi ne, %1, %c0_i32_0 : i32
    scf.if %2 {
      %cst_10 = arith.constant 0.000000e+00 : f32
      %12 = vector.broadcast %cst_10 : f32 to vector<64x512xf32>
      %c0_11 = arith.constant 0 : index
      %c0_12 = arith.constant 0 : index
      %13 = vector.load %arg7[%c0_11, %c0_12] : memref<64x512xf32, #tpu.memory_space<vmem>>, vector<64x512xf32>
      tpu.vector_store %arg7[%c0_11, %c0_12], %12 {strides = array<i32>} : memref<64x512xf32, #tpu.memory_space<vmem>>, vector<64x512xf32>,
    } else {
    }
    %c0 = arith.constant 0 : index
    %c0_1 = arith.constant 0 : index
    %3 = vector.load %arg7[%c0, %c0_1] : memref<64x512xf32, #tpu.memory_space<vmem>>, vector<64x512xf32>
    %c0_2 = arith.constant 0 : index
    %c0_3 = arith.constant 0 : index
    %4 = vector.load %arg3[%c0_2, %c0_3] : memref<64x128xbf16, #tpu.memory_space<vmem>>, vector<64x128xbf16>
    %c0_4 = arith.constant 0 : index
    %c0_5 = arith.constant 0 : index
    %5 = vector.load %arg4[%c0_4, %c0_5] : memref<128x512xbf16, #tpu.memory_space<vmem>>, vector<128x512xbf16>
    %cst = arith.constant dense<0.000000e+00> : vector<64x512xf32>
    %6 = tpu.matmul %4, %5, %cst {dimension_numbers = #tpu.dot_dimension_numbers<[1], [0], [0], [1], [0, 0, 1, 1], [], []>} : vector<64x128xbf16>, vector<128x512xbf16>, vector<64x512xf32> -> vector<64x512xf32>
    %7 = arith.addf %3, %6 : vector<64x512xf32>
    %c0_6 = arith.constant 0 : index
    %c0_7 = arith.constant 0 : index
    %8 = vector.load %arg7[%c0_6, %c0_7] : memref<64x512xf32, #tpu.memory_space<vmem>>, vector<64x512xf32>
    tpu.vector_store %arg7[%c0_6, %c0_7], %7 {strides = array<i32>} : memref<64x512xf32, #tpu.memory_space<vmem>>, vector<64x512xf32>,
    %c0_i32_8 = arith.constant 0 : i32
    %9 = arith.cmpi eq, %arg2, %c0_i32_8 : i32
    %10 = arith.extui %9 : i1 to i32
    %c0_i32_9 = arith.constant 0 : i32
    %11 = arith.cmpi ne, %10, %c0_i32_9 : i32
    scf.if %11 {
      %c0_10 = arith.constant 0 : index
      %c0_11 = arith.constant 0 : index
      %12 = vector.load %arg7[%c0_10, %c0_11] : memref<64x512xf32, #tpu.memory_space<vmem>>, vector<64x512xf32>
      %c0_12 = arith.constant 0 : index
      %c0_13 = arith.constant 0 : index
      %13 = vector.load %arg5[%c0_12, %c0_13] : memref<1x512xf32, #tpu.memory_space<vmem>>, vector<1x512xf32>
      %14 = vector.broadcast %13 : vector<1x512xf32> to vector<64x512xf32>
      %15 = arith.addf %12, %14 : vector<64x512xf32>
      %16 = arith.truncf %15 : vector<64x512xf32> to vector<64x512xbf16>
      %c0_14 = arith.constant 0 : index
      %c0_15 = arith.constant 0 : index
      %17 = vector.load %arg6[%c0_14, %c0_15] : memref<64x512xbf16, #tpu.memory_space<vmem>>, vector<64x512xbf16>
      tpu.vector_store %arg6[%c0_14, %c0_15], %16 {strides = array<i32>} : memref<64x512xbf16, #tpu.memory_space<vmem>>, vector<64x512xbf16>,
    } else {
    }
    return
  }
  func.func @transform_0(%arg0: i32, %arg1: i32, %arg2: i32) -> (i32, i32) {
    %c0_i32 = arith.constant 0 : i32
    return %arg0, %arg2 : i32, i32
  }
  func.func @transform_1(%arg0: i32, %arg1: i32, %arg2: i32) -> (i32, i32) {
    %c0_i32 = arith.constant 0 : i32
    return %arg2, %arg1 : i32, i32
  }
  func.func @transform_2(%arg0: i32, %arg1: i32, %arg2: i32) -> (i32, i32) {
    %c0_i32 = arith.constant 0 : i32
    %c0_i32_0 = arith.constant 0 : i32
    return %c0_i32, %arg1 : i32, i32
  }
  func.func @transform_3(%arg0: i32, %arg1: i32, %arg2: i32) -> (i32, i32) {
    %c0_i32 = arith.constant 0 : i32
    return %arg0, %arg1 : i32, i32
  }
}

module attributes {stable_mosaic.version = 11 : i64} {
  func.func @_matmul_bias_kernel(%arg0: i32, %arg1: i32, %arg2: i32, %arg3: memref<64x128xbf16, #tpu.memory_space<vmem>>, %arg4: memref<128x128xbf16, #tpu.memory_space<vmem>>, %arg5: memref<1x128xf32, #tpu.memory_space<vmem>>, %arg6: memref<64x128xf32, #tpu.memory_space<vmem>>, %arg7: memref<64x128xf32, #tpu.memory_space<vmem>>) attributes {dimension_semantics = [#tpu.dimension_semantics<parallel>, #tpu.dimension_semantics<parallel>, #tpu.dimension_semantics<arbitrary>], iteration_bounds = array<i64: 1, 1, 1>, scalar_prefetch = 0 : i64, scratch_operands = 1 : i64, tpu.core_type = #tpu.core_type<tc>, window_params = [{transform_indices = @transform_0, window_bounds = array<i64: 64, 128>}, {transform_indices = @transform_1, window_bounds = array<i64: 128, 128>}, {transform_indices = @transform_2, window_bounds = array<i64: 1, 128>}, {transform_indices = @transform_3, window_bounds = array<i64: 64, 128>}]} {
    %c0_i32 = arith.constant 0 : i32
    %0 = arith.cmpi eq, %arg2, %c0_i32 : i32
    %1 = arith.extui %0 : i1 to i32
    %c0_i32_0 = arith.constant 0 : i32
    %2 = arith.cmpi ne, %1, %c0_i32_0 : i32
    scf.if %2 {
      %cst_10 = arith.constant 0.000000e+00 : f32
      %12 = vector.broadcast %cst_10 : f32 to vector<64x128xf32>
      %c0_11 = arith.constant 0 : index
      %c0_12 = arith.constant 0 : index
      %13 = vector.load %arg7[%c0_11, %c0_12] : memref<64x128xf32, #tpu.memory_space<vmem>>, vector<64x128xf32>
      tpu.vector_store %arg7[%c0_11, %c0_12], %12 {strides = array<i32>} : memref<64x128xf32, #tpu.memory_space<vmem>>, vector<64x128xf32>,
    } else {
    }
    %c0 = arith.constant 0 : index
    %c0_1 = arith.constant 0 : index
    %3 = vector.load %arg7[%c0, %c0_1] : memref<64x128xf32, #tpu.memory_space<vmem>>, vector<64x128xf32>
    %c0_2 = arith.constant 0 : index
    %c0_3 = arith.constant 0 : index
    %4 = vector.load %arg3[%c0_2, %c0_3] : memref<64x128xbf16, #tpu.memory_space<vmem>>, vector<64x128xbf16>
    %c0_4 = arith.constant 0 : index
    %c0_5 = arith.constant 0 : index
    %5 = vector.load %arg4[%c0_4, %c0_5] : memref<128x128xbf16, #tpu.memory_space<vmem>>, vector<128x128xbf16>
    %cst = arith.constant dense<0.000000e+00> : vector<64x128xf32>
    %6 = tpu.matmul %4, %5, %cst {dimension_numbers = #tpu.dot_dimension_numbers<[1], [0], [0], [1], [0, 0, 1, 1], [], []>} : vector<64x128xbf16>, vector<128x128xbf16>, vector<64x128xf32> -> vector<64x128xf32>
    %7 = arith.addf %3, %6 : vector<64x128xf32>
    %c0_6 = arith.constant 0 : index
    %c0_7 = arith.constant 0 : index
    %8 = vector.load %arg7[%c0_6, %c0_7] : memref<64x128xf32, #tpu.memory_space<vmem>>, vector<64x128xf32>
    tpu.vector_store %arg7[%c0_6, %c0_7], %7 {strides = array<i32>} : memref<64x128xf32, #tpu.memory_space<vmem>>, vector<64x128xf32>,
    %c0_i32_8 = arith.constant 0 : i32
    %9 = arith.cmpi eq, %arg2, %c0_i32_8 : i32
    %10 = arith.extui %9 : i1 to i32
    %c0_i32_9 = arith.constant 0 : i32
    %11 = arith.cmpi ne, %10, %c0_i32_9 : i32
    scf.if %11 {
      %c0_10 = arith.constant 0 : index
      %c0_11 = arith.constant 0 : index
      %12 = vector.load %arg7[%c0_10, %c0_11] : memref<64x128xf32, #tpu.memory_space<vmem>>, vector<64x128xf32>
      %c0_12 = arith.constant 0 : index
      %c0_13 = arith.constant 0 : index
      %13 = vector.load %arg5[%c0_12, %c0_13] : memref<1x128xf32, #tpu.memory_space<vmem>>, vector<1x128xf32>
      %14 = vector.broadcast %13 : vector<1x128xf32> to vector<64x128xf32>
      %15 = arith.addf %12, %14 : vector<64x128xf32>
      %c0_14 = arith.constant 0 : index
      %c0_15 = arith.constant 0 : index
      %16 = vector.load %arg6[%c0_14, %c0_15] : memref<64x128xf32, #tpu.memory_space<vmem>>, vector<64x128xf32>
      tpu.vector_store %arg6[%c0_14, %c0_15], %15 {strides = array<i32>} : memref<64x128xf32, #tpu.memory_space<vmem>>, vector<64x128xf32>,
    } else {
    }
    return
  }
  func.func @transform_0(%arg0: i32, %arg1: i32, %arg2: i32) -> (i32, i32) {
    %c0_i32 = arith.constant 0 : i32
    return %arg0, %arg2 : i32, i32
  }
  func.func @transform_1(%arg0: i32, %arg1: i32, %arg2: i32) -> (i32, i32) {
    %c0_i32 = arith.constant 0 : i32
    return %arg2, %arg1 : i32, i32
  }
  func.func @transform_2(%arg0: i32, %arg1: i32, %arg2: i32) -> (i32, i32) {
    %c0_i32 = arith.constant 0 : i32
    %c0_i32_0 = arith.constant 0 : i32
    return %c0_i32, %arg1 : i32, i32
  }
  func.func @transform_3(%arg0: i32, %arg1: i32, %arg2: i32) -> (i32, i32) {
    %c0_i32 = arith.constant 0 : i32
    return %arg0, %arg1 : i32, i32
  }
}

</mosaic_0001>

<bundles_post_ra>
// kernel: char_lstm_forward.7
= control target key start
LH: loop header
LB: loop body
LE: loop exit
PB: predicated region body
PF: predicated region fallthrough
CT: control target
= control target key end

     0   :  { %8 = vsyncpa [#allocation4], 0  ;;  %s566_s0 = inlined_call_operand.hbm [shape: bf16[64,128], index: 0, kind: input, shape index: {}]   ;;  %s567_s1 = inlined_call_operand.hbm [shape: bf16[128,128], index: 1, kind: input, shape index: {}]   ;;  %s568_s2 = inlined_call_operand.hbm [shape: f32[1,128], index: 2, kind: input, shape index: {}]   ;;  %s569_s3 = inlined_call_operand.hbm [shape: f32[64,128], index: 3, kind: output, shape index: {}]  }
   0x1   :  { %9 = vsyncpa [#allocation7], 0 }
   0x2   :  { %10 = vsyncpa [#allocation5], 0  ;;  %s483_s12 = smov [#allocation6]   ;;  %s484_s14 = smov [#allocation3]  }
   0x3   :  { %s28_s13 = sshll.u32 %s483_s12, 4  ;;  %s16_s15 = sshll.u32 %s484_s14, 4  ;;  %s29_s13 = int_to_ptr.vmem [resolvable:$true] %s28_s13  ;;  %s511_s15 = int_to_ptr.vmem [resolvable:$true] %s16_s15 }
   0x4   :  { %s389_s18 = scalar_lea.hbm %s567_s1, 1024 }
   0x5   :  { %p390_p0 = scmp.ne.s32.totalorder %s567_s1, %s389_s18  ;;  %p393_p1 = scmp.lt.u32.totalorder %s389_s18, %s567_s1 }
   0x7   :  { %p395_p2 = pnand %p393_p1, %p390_p0 }
   0x9   :  { %398 = shalt.err (!%p395_p2)
}
   0xa   :  { %s399_s23 = scalar_lea.vmem %s29_s13, 1024  ;;  %p404_p4 = scmp.lt.s32.totalorder %s29_s13, %s29_s13 }
   0xb   :  { %p400_p3 = scmp.ne.s32.totalorder %s29_s13, %s399_s23  ;;  %p405_p5 = scmp.lt.s32.totalorder %s399_s23, %s399_s23 }
   0xd   :  { %p406_p6 = por %p405_p5, %p404_p4 }
   0xf   :  { %p407_p7 = pnand %p406_p6, %p400_p3 }
  0x11   :  { %410 = shalt.err (!%p407_p7)
}
  0x12   :  { %s485_s24 = smov 64   ;;  %s486_s25 = smov 4  }
  0x13   :  { %34 = dma.hbm_to_vmem [thread:$0]  %s567_s1, 1024, %s29_s13, [#allocation7], %s485_s24, %s485_s24, %s486_s25  }
  0x14   :  { %s411_s30 = scalar_lea.hbm %s566_s0, 512 }
  0x15   :  { %p412_p8 = scmp.ne.s32.totalorder %s566_s0, %s411_s30  ;;  %p415_p9 = scmp.lt.u32.totalorder %s411_s30, %s566_s0 }
  0x17   :  { %p417_p10 = pnand %p415_p9, %p412_p8 }
  0x19   :  { %420 = shalt.err (!%p417_p10)
}
  0x1a   :  { %s421_s8 = scalar_lea.vmem %s511_s15, 512  ;;  %p426_p12 = scmp.lt.s32.totalorder %s511_s15, %s511_s15 }
  0x1b   :  { %p422_p11 = scmp.ne.s32.totalorder %s511_s15, %s421_s8  ;;  %p427_p13 = scmp.lt.s32.totalorder %s421_s8, %s421_s8 }
  0x1d   :  { %p428_p0 = por %p427_p13, %p426_p12 }
  0x1f   :  { %p429_p1 = pnand %p428_p0, %p422_p11 }
  0x21   :  { %432 = shalt.err (!%p429_p1)
}
  0x22   :  { %22 = dma.hbm_to_vmem [thread:$0]  %s566_s0, 512, %s511_s15, [#allocation4], %s485_s24, %s485_s24, %s486_s25  }
  0x23   :  { %s487_s10 = smov [#allocation8]   ;;  %s433_s14 = scalar_lea.hbm %s568_s2, 16 }
  0x24   :  { %s41_s11 = sshll.u32 %s487_s10, 4  ;;  %p434_p2 = scmp.ne.s32.totalorder %s568_s2, %s433_s14  ;;  %s42_s11 = int_to_ptr.vmem [resolvable:$true] %s41_s11 }
  0x25   :  { %p437_p3 = scmp.lt.u32.totalorder %s433_s14, %s568_s2 }
  0x27   :  { %p439_p4 = pnand %p437_p3, %p434_p2 }
  0x29   :  { %442 = shalt.err (!%p439_p4)
}
  0x2a   :  { %s443_s20 = scalar_lea.vmem %s42_s11, 16  ;;  %s447_s0 = scalar_lea.vmem %s42_s11, 32 }
  0x2b   :  { %p444_p5 = scmp.ne.s32.totalorder %s42_s11, %s443_s20  ;;  %p448_p6 = scmp.lt.s32.totalorder %s42_s11, %s42_s11 }
  0x2c   :  { %p449_p7 = scmp.lt.s32.totalorder %s447_s0, %s443_s20 }
  0x2e   :  { %p450_p8 = por %p449_p7, %p448_p6 }
  0x30   :  { %p451_p9 = pnand %p450_p8, %p444_p5 }
  0x32   :  { %454 = shalt.err (!%p451_p9)
}
  0x33   :  { %44 = dma.hbm_to_vmem [thread:$0]  %s568_s2, 16, %s42_s11, [#allocation7]  }
  0x34   :  { %477 = dma.done.wait [#allocation4], 512  }
  0x35   :  { %478 = vsyncadd [#allocation4], 4294966784 }
  0x36   :  { %479 = dma.done.wait [#allocation7], 1040  }
  0x37   :  { %480 = vsyncadd [#allocation7], 4294966256  ;;  %v377_v0 = vld [vmem:[#allocation6] sm:$0xff]   ;;  %v378_v1 = vld [vmem:[#allocation6 + $0x8] sm:$0xff]   ;;  %s488_s2 = smov [#allocation9]  }
  0x38   :  { %329 = vmatprep.subr.bf16.mxu0 %v377_v0  ;;  %353 = vmatprep.subr.bf16.mxu1 %v377_v0  ;;  %v379_v2 = vld [vmem:[#allocation6 + $0x10] sm:$0xff]   ;;  %v380_v3 = vld [vmem:[#allocation6 + $0x18] sm:$0xff]   ;;  %v385_v4 = vld [vmem:[#allocation3] sm:$0xff]   ;;  %s291_s22 = sshll.u32 %s488_s2, 4  ;;  %s292_s22 = int_to_ptr.vmem [resolvable:$true] %s291_s22 }
  0x39   :  { %330 = vmatpush3.bf16.msra.mxu0 %v377_v0  ;;  %361 = vmatpush3.bf16.msra.mxu1 %v377_v0  ;;  %v386_v5 = vld [vmem:[#allocation3 + $0x10] sm:$0xff]   ;;  %v381_v6 = vld [vmem:[#allocation6 + $0x20] sm:$0xff]   ;;  %v382_v7 = vld [vmem:[#allocation6 + $0x28] sm:$0xff]   ;;  %s455_s23 = scalar_lea.vmem %s292_s22, 1024  ;;  %p460_p11 = scmp.lt.s32.totalorder %s292_s22, %s292_s22 }
  0x3a   :  { %331 = vmatprep.subr.bf16.mxu0 %v378_v1  ;;  %354 = vmatprep.subr.bf16.mxu1 %v378_v1  ;;  %v383_v8 = vld [vmem:[#allocation6 + $0x30] sm:$0xff]   ;;  %v384_v9 = vld [vmem:[#allocation6 + $0x38] sm:$0xff]   ;;  %v387_v10 = vld [vmem:[#allocation3 + $0x8] sm:$0xff]   ;;  %p456_p10 = scmp.ne.s32.totalorder %s292_s22, %s455_s23  ;;  %p461_p12 = scmp.lt.s32.totalorder %s455_s23, %s455_s23 }
  0x3b   :  { %345 = vmatprep.mubr.bf16.mxu0 %v385_v4  ;;  %349 = vmatprep.mubr.bf16.mxu1 %v386_v5  ;;  %v388_v11 = vld [vmem:[#allocation3 + $0x18] sm:$0xff]   ;;  %v316_v12 = vld [vmem:[#allocation8] ss:$0 sm:$0xff] }
  0x3c   :  { %p462_p13 = por %p461_p12, %p460_p11 }
  0x3d   :  { %332 = vmatpush3.bf16.msra.mxu0 %v378_v1  ;;  %362 = vmatpush3.bf16.msra.mxu1 %v378_v1 }
  0x3e   :  { %333 = vmatprep.subr.bf16.mxu0 %v379_v2  ;;  %355 = vmatprep.subr.bf16.mxu1 %v379_v2  ;;  %p463_p0 = pnand %p462_p13, %p456_p10 }
  0x41   :  { %334 = vmatpush3.bf16.msra.mxu0 %v379_v2  ;;  %363 = vmatpush3.bf16.msra.mxu1 %v379_v2 }
  0x42   :  { %335 = vmatprep.subr.bf16.mxu0 %v380_v3  ;;  %356 = vmatprep.subr.bf16.mxu1 %v380_v3 }
  0x45   :  { %336 = vmatpush3.bf16.msra.mxu0 %v380_v3  ;;  %364 = vmatpush3.bf16.msra.mxu1 %v380_v3 }
  0x46   :  { %337 = vmatprep.subr.bf16.mxu0 %v381_v6  ;;  %357 = vmatprep.subr.bf16.mxu1 %v381_v6 }
  0x49   :  { %338 = vmatpush3.bf16.msra.mxu0 %v381_v6  ;;  %365 = vmatpush3.bf16.msra.mxu1 %v381_v6 }
  0x4a   :  { %339 = vmatprep.subr.bf16.mxu0 %v382_v7  ;;  %358 = vmatprep.subr.bf16.mxu1 %v382_v7 }
  0x4d   :  { %340 = vmatpush3.bf16.msra.mxu0 %v382_v7  ;;  %366 = vmatpush3.bf16.msra.mxu1 %v382_v7 }
  0x4e   :  { %341 = vmatprep.subr.bf16.mxu0 %v383_v8  ;;  %359 = vmatprep.subr.bf16.mxu1 %v383_v8 }
  0x51   :  { %342 = vmatpush3.bf16.msra.mxu0 %v383_v8  ;;  %367 = vmatpush3.bf16.msra.mxu1 %v383_v8 }
  0x52   :  { %343 = vmatprep.subr.bf16.mxu0 %v384_v9  ;;  %360 = vmatprep.subr.bf16.mxu1 %v384_v9 }
  0x55   :  { %344 = vmatpush3.bf16.msra.mxu0 %v384_v9  ;;  %368 = vmatpush3.bf16.msra.mxu1 %v384_v9 }
  0x58   :  { %346 = vmatmul.mubr.bf16.vlgmr.msra.gmra.mrb[0].mxu0 %v387_v10  ;;  %350 = vmatmul.mubr.bf16.vlgmr.msra.gmra.mrb[0].mxu1 %v388_v11 }
 0x12b   :  { %v347_v13 = vpop.f32.mrb[0].mxu0  ;;  %v351_v14 = vpop.f32.mrb[0].mxu1 }
 0x12c   :  { %v272_v15 = vadd.f32 %v347_v13, %v316_v12  ;;  %v276_v16 = vadd.f32 %v351_v14, %v316_v12  ;;  %v205_v17 = vpop.f32.mrb[1].mxu0  ;;  %v221_v18 = vpop.f32.mrb[1].mxu1 }
 0x12d   :  { %v270_v19 = vadd.f32 %v316_v12, %v205_v17  ;;  %v274_v20 = vadd.f32 %v316_v12, %v221_v18  ;;  %v348_v21 = vpop.f32.mrb[2].mxu0  ;;  %v352_v22 = vpop.f32.mrb[2].mxu1 }
 0x12e   :  { %280 = vst [vmem:[#allocation9 + $0x10] sm:$0xff] %v272_v15  ;;  %284 = vst [vmem:[#allocation9 + $0x30] sm:$0xff] %v276_v16  ;;  %v273_v23 = vadd.f32 %v348_v21, %v316_v12  ;;  %v277_v24 = vadd.f32 %v352_v22, %v316_v12  ;;  %v208_v25 = vpop.f32.mrb[3].mxu0  ;;  %v224_v26 = vpop.f32.mrb[3].mxu1 }
 0x12f   :  { %278 = vst [vmem:[#allocation9] sm:$0xff] %v270_v19  ;;  %282 = vst [vmem:[#allocation9 + $0x20] sm:$0xff] %v274_v20  ;;  %v271_v27 = vadd.f32 %v316_v12, %v208_v25  ;;  %v275_v28 = vadd.f32 %v316_v12, %v224_v26 }
 0x130   :  { %281 = vst [vmem:[#allocation9 + $0x18] sm:$0xff] %v273_v23  ;;  %285 = vst [vmem:[#allocation9 + $0x38] sm:$0xff] %v277_v24 }
 0x131   :  { %279 = vst [vmem:[#allocation9 + $0x8] sm:$0xff] %v271_v27  ;;  %283 = vst [vmem:[#allocation9 + $0x28] sm:$0xff] %v275_v28 }
 0x132   :  { %466 = shalt.err (!%p463_p0)
}
 0x133   :  { %s467_s26 = scalar_lea.hbm %s569_s3, 1024 }
 0x134   :  { %p468_p1 = scmp.ne.s32.totalorder %s569_s3, %s467_s26  ;;  %p471_p2 = scmp.lt.u32.totalorder %s467_s26, %s569_s3 }
 0x136   :  { %p473_p3 = pnand %p471_p2, %p468_p1 }
 0x138   :  { %476 = shalt.err (!%p473_p3)
}
 0x139   :  { %s489_s4 = smov 128   ;;  %s490_s5 = smov 8  }
 0x13a   :  { %297 = dma.vmem_to_hbm [thread:$0]  %s292_s22, 1024, %s569_s3, [#allocation5], %s489_s4, %s489_s4, %s490_s5  }
 0x13b   :  { %481 = dma.done.wait [#allocation5], 1024  }
 0x13c   :  { %482 = vsyncadd [#allocation5], 4294966272 }
 0x13d   :  { %301 = vsyncpa [#allocation4], 1 }
 0x13e   :  { %302 = vsyncpa [#allocation7], 1 }
 0x13f   :  { %303 = vsyncpa [#allocation5], 1 }

// kernel: char_lstm_forward.5
= control target key start
LH: loop header
LB: loop body
LE: loop exit
PB: predicated region body
PF: predicated region fallthrough
CT: control target
= control target key end

     0   :  { %8 = vsyncpa [#allocation4], 0  ;;  %s1130_s0 = inlined_call_operand.hbm [shape: bf16[64,128], index: 0, kind: input, shape index: {}]   ;;  %s1131_s1 = inlined_call_operand.hbm [shape: bf16[128,512], index: 1, kind: input, shape index: {}]   ;;  %s1132_s2 = inlined_call_operand.hbm [shape: f32[1,512], index: 2, kind: input, shape index: {}]   ;;  %s1133_s3 = inlined_call_operand.hbm [shape: bf16[64,512], index: 3, kind: output, shape index: {}]  }
   0x1   :  { %9 = vsyncpa [#allocation7], 0 }
   0x2   :  { %10 = vsyncpa [#allocation5], 0  ;;  %s999_s12 = smov [#allocation6]   ;;  %s905_s16 = scalar_lea.hbm %s1131_s1, 4096 }
   0x3   :  { %s28_s13 = sshll.u32 %s999_s12, 4  ;;  %p906_p0 = scmp.ne.s32.totalorder %s1131_s1, %s905_s16  ;;  %s29_s13 = int_to_ptr.vmem [resolvable:$true] %s28_s13 }
   0x4   :  { %p909_p1 = scmp.lt.u32.totalorder %s905_s16, %s1131_s1 }
   0x6   :  { %p911_p2 = pnand %p909_p1, %p906_p0 }
   0x8   :  { %914 = shalt.err (!%p911_p2)
}
   0x9   :  { %s915_s21 = scalar_lea.vmem %s29_s13, 4096  ;;  %p920_p4 = scmp.lt.s32.totalorder %s29_s13, %s29_s13 }
   0xa   :  { %p916_p3 = scmp.ne.s32.totalorder %s29_s13, %s915_s21  ;;  %p921_p5 = scmp.lt.s32.totalorder %s915_s21, %s915_s21 }
   0xc   :  { %p922_p6 = por %p921_p5, %p920_p4 }
   0xe   :  { %p923_p7 = pnand %p922_p6, %p916_p3 }
  0x10   :  { %926 = shalt.err (!%p923_p7)
}
  0x11   :  { %s1000_s22 = smov 256   ;;  %s1001_s23 = smov 16  }
  0x12   :  { %34 = dma.hbm_to_vmem [thread:$0]  %s1131_s1, 4096, %s29_s13, [#allocation7], %s1000_s22, %s1000_s22, %s1001_s23  }
  0x13   :  { %s1002_s26 = smov [#allocation3]   ;;  %s927_s30 = scalar_lea.hbm %s1130_s0, 512 }
  0x14   :  { %s16_s27 = sshll.u32 %s1002_s26, 4  ;;  %p928_p8 = scmp.ne.s32.totalorder %s1130_s0, %s927_s30  ;;  %s17_s27 = int_to_ptr.vmem [resolvable:$true] %s16_s27 }
  0x15   :  { %p931_p9 = scmp.lt.u32.totalorder %s927_s30, %s1130_s0 }
  0x17   :  { %p933_p10 = pnand %p931_p9, %p928_p8 }
  0x19   :  { %936 = shalt.err (!%p933_p10)
}
  0x1a   :  { %s937_s8 = scalar_lea.vmem %s17_s27, 512  ;;  %p942_p12 = scmp.lt.s32.totalorder %s17_s27, %s17_s27 }
  0x1b   :  { %p938_p11 = scmp.ne.s32.totalorder %s17_s27, %s937_s8  ;;  %p943_p13 = scmp.lt.s32.totalorder %s937_s8, %s937_s8 }
  0x1d   :  { %p944_p0 = por %p943_p13, %p942_p12 }
  0x1f   :  { %p945_p1 = pnand %p944_p0, %p938_p11 }
  0x21   :  { %948 = shalt.err (!%p945_p1)
}
  0x22   :  { %s1003_s1 = smov 64   ;;  %s1004_s9 = smov 4  }
  0x23   :  { %22 = dma.hbm_to_vmem [thread:$0]  %s1130_s0, 512, %s17_s27, [#allocation4], %s1003_s1, %s1003_s1, %s1004_s9  }
  0x24   :  { %s1005_s12 = smov [#allocation8]   ;;  %s949_s16 = scalar_lea.hbm %s1132_s2, 64 }
  0x25   :  { %s41_s13 = sshll.u32 %s1005_s12, 4  ;;  %p950_p2 = scmp.ne.s32.totalorder %s1132_s2, %s949_s16  ;;  %s42_s13 = int_to_ptr.vmem [resolvable:$true] %s41_s13 }
  0x26   :  { %p953_p3 = scmp.lt.u32.totalorder %s949_s16, %s1132_s2 }
  0x28   :  { %p955_p4 = pnand %p953_p3, %p950_p2 }
  0x2a   :  { %958 = shalt.err (!%p955_p4)
}
  0x2b   :  { %s959_s21 = scalar_lea.vmem %s42_s13, 64  ;;  %p964_p6 = scmp.lt.s32.totalorder %s42_s13, %s42_s13 }
  0x2c   :  { %p960_p5 = scmp.ne.s32.totalorder %s42_s13, %s959_s21  ;;  %p965_p7 = scmp.lt.s32.totalorder %s959_s21, %s959_s21 }
  0x2e   :  { %p966_p8 = por %p965_p7, %p964_p6 }
  0x30   :  { %p967_p9 = pnand %p966_p8, %p960_p5 }
  0x32   :  { %970 = shalt.err (!%p967_p9)
}
  0x33   :  { %44 = dma.hbm_to_vmem [thread:$0]  %s1132_s2, 64, %s42_s13, [#allocation7]  }
  0x34   :  { %993 = dma.done.wait [#allocation4], 512  }
  0x35   :  { %994 = vsyncadd [#allocation4], 4294966784 }
  0x36   :  { %995 = dma.done.wait [#allocation7], 4160  }
  0x37   :  { %996 = vsyncadd [#allocation7], 4294963136  ;;  %v1006_v0 = vmov 0   ;;  %v853_v1 = vld [vmem:[#allocation6 + $0x4] ss:$16 sps:$4 sm:$0xff]   ;;  %v902_v34 = vld [vmem:[#allocation3 + $0x8] sm:$0xff]   ;;  %v594_v37 = vlaneseq }
  0x38   :  { %379 = vmatprep.mubr.bf16.mxu0 %v1006_v0  ;;  %452 = vmatprep.mubr.bf16.mxu1 %v1006_v0  ;;  %v855_v2 = vld [vmem:[#allocation6 + $0xc] ss:$16 sps:$4 sm:$0xff]   ;;  %v857_v3 = vld [vmem:[#allocation6] ss:$16 sps:$4 sm:$0xff]   ;;  %v858_v4 = vld [vmem:[#allocation6 + $0x8] ss:$16 sps:$4 sm:$0xff]  }
  0x39   :  { %347 = vmatprep.subr.bf16.mxu0 %v853_v1  ;;  %420 = vmatprep.subr.bf16.mxu1 %v855_v2  ;;  %v859_v5 = vld [vmem:[#allocation6 + $0x24] ss:$16 sps:$4 sm:$0xff]   ;;  %v861_v6 = vld [vmem:[#allocation6 + $0x2c] ss:$16 sps:$4 sm:$0xff]   ;;  %v863_v7 = vld [vmem:[#allocation6 + $0x20] ss:$16 sps:$4 sm:$0xff]  }
  0x3a   :  { %348 = vmatpush1.bf16.msra.mxu0 %v857_v3  ;;  %421 = vmatpush1.bf16.msra.mxu1 %v858_v4  ;;  %v864_v8 = vld [vmem:[#allocation6 + $0x28] ss:$16 sps:$4 sm:$0xff]   ;;  %v865_v9 = vld [vmem:[#allocation6 + $0x44] ss:$16 sps:$4 sm:$0xff]   ;;  %v867_v10 = vld [vmem:[#allocation6 + $0x4c] ss:$16 sps:$4 sm:$0xff]  }
  0x3b   :  { %349 = vmatprep.subr.bf16.mxu0 %v859_v5  ;;  %422 = vmatprep.subr.bf16.mxu1 %v861_v6  ;;  %v869_v11 = vld [vmem:[#allocation6 + $0x40] ss:$16 sps:$4 sm:$0xff]   ;;  %v870_v12 = vld [vmem:[#allocation6 + $0x48] ss:$16 sps:$4 sm:$0xff]   ;;  %v871_v13 = vld [vmem:[#allocation6 + $0x64] ss:$16 sps:$4 sm:$0xff]  }
  0x3c   :  { %v873_v14 = vld [vmem:[#allocation6 + $0x6c] ss:$16 sps:$4 sm:$0xff]   ;;  %v875_v15 = vld [vmem:[#allocation6 + $0x60] ss:$16 sps:$4 sm:$0xff]   ;;  %v876_v16 = vld [vmem:[#allocation6 + $0x68] ss:$16 sps:$4 sm:$0xff]  }
  0x3d   :  { %v877_v17 = vld [vmem:[#allocation6 + $0x84] ss:$16 sps:$4 sm:$0xff]   ;;  %v879_v18 = vld [vmem:[#allocation6 + $0x8c] ss:$16 sps:$4 sm:$0xff]   ;;  %v881_v19 = vld [vmem:[#allocation6 + $0x80] ss:$16 sps:$4 sm:$0xff]  }
  0x3e   :  { %350 = vmatpush1.bf16.msra.mxu0 %v863_v7  ;;  %423 = vmatpush1.bf16.msra.mxu1 %v864_v8  ;;  %v882_v20 = vld [vmem:[#allocation6 + $0x88] ss:$16 sps:$4 sm:$0xff]   ;;  %v883_v21 = vld [vmem:[#allocation6 + $0xa4] ss:$16 sps:$4 sm:$0xff]   ;;  %v885_v22 = vld [vmem:[#allocation6 + $0xac] ss:$16 sps:$4 sm:$0xff]  }
  0x3f   :  { %351 = vmatprep.subr.bf16.mxu0 %v865_v9  ;;  %424 = vmatprep.subr.bf16.mxu1 %v867_v10  ;;  %v887_v23 = vld [vmem:[#allocation6 + $0xa0] ss:$16 sps:$4 sm:$0xff]   ;;  %v888_v24 = vld [vmem:[#allocation6 + $0xa8] ss:$16 sps:$4 sm:$0xff]   ;;  %v889_v25 = vld [vmem:[#allocation6 + $0xc4] ss:$16 sps:$4 sm:$0xff]  }
  0x40   :  { %v891_v26 = vld [vmem:[#allocation6 + $0xcc] ss:$16 sps:$4 sm:$0xff]   ;;  %v893_v27 = vld [vmem:[#allocation6 + $0xc0] ss:$16 sps:$4 sm:$0xff]   ;;  %v894_v28 = vld [vmem:[#allocation6 + $0xc8] ss:$16 sps:$4 sm:$0xff]  }
  0x41   :  { %v895_v29 = vld [vmem:[#allocation6 + $0xe4] ss:$16 sps:$4 sm:$0xff]   ;;  %v897_v30 = vld [vmem:[#allocation6 + $0xec] ss:$16 sps:$4 sm:$0xff]   ;;  %v899_v31 = vld [vmem:[#allocation6 + $0xe0] ss:$16 sps:$4 sm:$0xff]  }
  0x42   :  { %352 = vmatpush1.bf16.msra.mxu0 %v869_v11  ;;  %425 = vmatpush1.bf16.msra.mxu1 %v870_v12  ;;  %v900_v32 = vld [vmem:[#allocation6 + $0xe8] ss:$16 sps:$4 sm:$0xff]   ;;  %v901_v33 = vld [vmem:[#allocation3] sm:$0xff]   ;;  %v903_v35 = vld [vmem:[#allocation3 + $0x10] sm:$0xff]   ;;  %v595_v38 = vshrl.u32 %v594_v37, 7  ;;  %s1007_s2 = smov [#allocation9]  }
  0x43   :  { %353 = vmatprep.subr.bf16.mxu0 %v871_v13  ;;  %426 = vmatprep.subr.bf16.mxu1 %v873_v14  ;;  %v904_v36 = vld [vmem:[#allocation3 + $0x18] sm:$0xff]   ;;  %v592_v41 = vld [vmem:[#allocation8] sm:$0xf]  ;;  %s763_s25 = sshll.u32 %s1007_s2, 4  ;;  %s764_s25 = int_to_ptr.vmem [resolvable:$true] %s763_s25 }
  0x44   :  { %v596_v39 = vsub.s32 0, %v595_v38  ;;  %v604_v40 = vsub.s32 2, %v595_v38  ;;  %v600_v42 = vsub.s32 1, %v595_v38  ;;  %v608_v43 = vsub.s32 3, %v595_v38  ;;  %s971_s26 = scalar_lea.vmem %s764_s25, 2048  ;;  %p976_p11 = scmp.lt.s32.totalorder %s764_s25, %s764_s25 }
  0x45   :  { %p972_p10 = scmp.ne.s32.totalorder %s764_s25, %s971_s26  ;;  %p977_p12 = scmp.lt.s32.totalorder %s971_s26, %s971_s26 }
  0x46   :  { %354 = vmatpush1.bf16.msra.mxu0 %v875_v15  ;;  %427 = vmatpush1.bf16.msra.mxu1 %v876_v16  ;;  %v1075_v44 = vrot.slane %v592_v41, %v596_v39  ;;  %v1077_v45 = vrot.slane %v592_v41, %v604_v40  ;;  %v1079_v46 = vrot.slane %v592_v41, %v600_v42 }
  0x47   :  { %355 = vmatprep.subr.bf16.mxu0 %v877_v17  ;;  %428 = vmatprep.subr.bf16.mxu1 %v879_v18  ;;  %v1081_v47 = vrot.slane %v592_v41, %v608_v43  ;;  %p978_p13 = por %p977_p12, %p976_p11 }
  0x49   :  { %p979_p0 = pnand %p978_p13, %p972_p10 }
  0x4a   :  { %356 = vmatpush1.bf16.msra.mxu0 %v881_v19  ;;  %429 = vmatpush1.bf16.msra.mxu1 %v882_v20 }
  0x4b   :  { %357 = vmatprep.subr.bf16.mxu0 %v883_v21  ;;  %430 = vmatprep.subr.bf16.mxu1 %v885_v22 }
  0x4e   :  { %358 = vmatpush1.bf16.msra.mxu0 %v887_v23  ;;  %431 = vmatpush1.bf16.msra.mxu1 %v888_v24 }
  0x4f   :  { %359 = vmatprep.subr.bf16.mxu0 %v889_v25  ;;  %432 = vmatprep.subr.bf16.mxu1 %v891_v26 }
  0x52   :  { %360 = vmatpush1.bf16.msra.mxu0 %v893_v27  ;;  %433 = vmatpush1.bf16.msra.mxu1 %v894_v28 }
  0x53   :  { %361 = vmatprep.subr.bf16.mxu0 %v895_v29  ;;  %434 = vmatprep.subr.bf16.mxu1 %v897_v30 }
  0x56   :  { %362 = vmatpush1.bf16.msra.mxu0 %v899_v31  ;;  %435 = vmatpush1.bf16.msra.mxu1 %v900_v32 }
  0x59   :  { %380 = vmatmul.mubr.bf16.vlgmr.msra.gmra.mrb[0].mxu0 %v901_v33  ;;  %453 = vmatmul.mubr.bf16.vlgmr.msra.gmra.mrb[0].mxu1 %v901_v33 }
  0x5a   :  { %389 = vmatprep.mubr.bf16.mxu0 %v1006_v0  ;;  %462 = vmatprep.mubr.bf16.mxu1 %v1006_v0 }
  0x61   :  { %390 = vmatmul.mubr.bf16.gmra.mrb[4].mxu0 %v902_v34  ;;  %463 = vmatmul.mubr.bf16.gmra.mrb[4].mxu1 %v902_v34 }
  0x62   :  { %399 = vmatprep.mubr.bf16.mxu0 %v1006_v0  ;;  %472 = vmatprep.mubr.bf16.mxu1 %v1006_v0 }
  0x69   :  { %400 = vmatmul.mubr.bf16.gmra.mrb[8].mxu0 %v903_v35  ;;  %473 = vmatmul.mubr.bf16.gmra.mrb[8].mxu1 %v903_v35 }
  0x6a   :  { %409 = vmatprep.mubr.bf16.mxu0 %v1006_v0  ;;  %482 = vmatprep.mubr.bf16.mxu1 %v1006_v0 }
  0x71   :  { %410 = vmatmul.mubr.bf16.gmra.mrb[12].mxu0 %v904_v36  ;;  %483 = vmatmul.mubr.bf16.gmra.mrb[12].mxu1 %v904_v36 }
 0x12c   :  { %v381_v48 = vpop.f32.mrb[0].mxu0  ;;  %v454_v49 = vpop.f32.mrb[0].mxu1 }
 0x12d   :  { %v614_v50 = vadd.f32 %v1075_v44, %v381_v48  ;;  %v616_v51 = vadd.f32 %v1077_v45, %v454_v49  ;;  %v383_v52 = vpop.f32.mrb[1].mxu0  ;;  %v456_v53 = vpop.f32.mrb[1].mxu1 }
 0x12e   :  { %v615_v54 = vadd.f32 %v1079_v46, %v383_v52  ;;  %v617_v55 = vadd.f32 %v1081_v47, %v456_v53  ;;  %v385_v56 = vpop.f32.mrb[2].mxu0  ;;  %v458_v57 = vpop.f32.mrb[2].mxu1 }
 0x12f   :  { %v618_v58 = vadd.f32 %v1075_v44, %v385_v56  ;;  %v620_v59 = vadd.f32 %v1077_v45, %v458_v57  ;;  %v387_v60 = vpop.f32.mrb[3].mxu0  ;;  %v460_v61 = vpop.f32.mrb[3].mxu1 }
 0x130   :  { %v828_v62 = vpack.c.bf16 %v615_v54, %v614_v50  ;;  %v829_v63 = vpack.c.bf16 %v617_v55, %v616_v51  ;;  %v619_v0 = vadd.f32 %v1079_v46, %v387_v60  ;;  %v621_v1 = vadd.f32 %v1081_v47, %v460_v61 }
 0x132   :  { %742 = vst [vmem:[#allocation9] sm:$0xff] %v828_v62  ;;  %743 = vst [vmem:[#allocation9 + $0x8] sm:$0xff] %v829_v63  ;;  %v830_v2 = vpack.c.bf16 %v619_v0, %v618_v58  ;;  %v831_v3 = vpack.c.bf16 %v621_v1, %v620_v59 }
 0x134   :  { %744 = vst [vmem:[#allocation9 + $0x10] sm:$0xff] %v830_v2  ;;  %745 = vst [vmem:[#allocation9 + $0x18] sm:$0xff] %v831_v3  ;;  %v391_v4 = vpop.f32.mrb[4].mxu0  ;;  %v464_v5 = vpop.f32.mrb[4].mxu1 }
 0x135   :  { %v622_v6 = vadd.f32 %v1075_v44, %v391_v4  ;;  %v624_v7 = vadd.f32 %v1077_v45, %v464_v5  ;;  %v393_v8 = vpop.f32.mrb[5].mxu0  ;;  %v466_v9 = vpop.f32.mrb[5].mxu1 }
 0x136   :  { %v623_v10 = vadd.f32 %v1079_v46, %v393_v8  ;;  %v625_v11 = vadd.f32 %v1081_v47, %v466_v9  ;;  %v395_v12 = vpop.f32.mrb[6].mxu0  ;;  %v468_v13 = vpop.f32.mrb[6].mxu1 }
 0x137   :  { %v626_v14 = vadd.f32 %v1075_v44, %v395_v12  ;;  %v628_v15 = vadd.f32 %v1077_v45, %v468_v13  ;;  %v397_v16 = vpop.f32.mrb[7].mxu0  ;;  %v470_v17 = vpop.f32.mrb[7].mxu1 }
 0x138   :  { %v832_v18 = vpack.c.bf16 %v623_v10, %v622_v6  ;;  %v833_v19 = vpack.c.bf16 %v625_v11, %v624_v7  ;;  %v627_v20 = vadd.f32 %v1079_v46, %v397_v16  ;;  %v629_v21 = vadd.f32 %v1081_v47, %v470_v17 }
 0x13a   :  { %746 = vst [vmem:[#allocation9 + $0x20] sm:$0xff] %v832_v18  ;;  %747 = vst [vmem:[#allocation9 + $0x28] sm:$0xff] %v833_v19  ;;  %v834_v22 = vpack.c.bf16 %v627_v20, %v626_v14  ;;  %v835_v23 = vpack.c.bf16 %v629_v21, %v628_v15 }
 0x13c   :  { %748 = vst [vmem:[#allocation9 + $0x30] sm:$0xff] %v834_v22  ;;  %749 = vst [vmem:[#allocation9 + $0x38] sm:$0xff] %v835_v23  ;;  %v401_v24 = vpop.f32.mrb[8].mxu0  ;;  %v474_v25 = vpop.f32.mrb[8].mxu1 }
 0x13d   :  { %v630_v26 = vadd.f32 %v1075_v44, %v401_v24  ;;  %v632_v27 = vadd.f32 %v1077_v45, %v474_v25  ;;  %v403_v28 = vpop.f32.mrb[9].mxu0  ;;  %v476_v29 = vpop.f32.mrb[9].mxu1 }
 0x13e   :  { %v631_v30 = vadd.f32 %v1079_v46, %v403_v28  ;;  %v633_v31 = vadd.f32 %v1081_v47, %v476_v29  ;;  %v405_v32 = vpop.f32.mrb[10].mxu0  ;;  %v478_v33 = vpop.f32.mrb[10].mxu1 }
 0x13f   :  { %v634_v34 = vadd.f32 %v1075_v44, %v405_v32  ;;  %v636_v35 = vadd.f32 %v1077_v45, %v478_v33  ;;  %v407_v36 = vpop.f32.mrb[11].mxu0  ;;  %v480_v37 = vpop.f32.mrb[11].mxu1 }
 0x140   :  { %v836_v38 = vpack.c.bf16 %v631_v30, %v630_v26  ;;  %v837_v39 = vpack.c.bf16 %v633_v31, %v632_v27  ;;  %v635_v40 = vadd.f32 %v1079_v46, %v407_v36  ;;  %v637_v41 = vadd.f32 %v1081_v47, %v480_v37 }
 0x142   :  { %750 = vst [vmem:[#allocation9 + $0x40] sm:$0xff] %v836_v38  ;;  %751 = vst [vmem:[#allocation9 + $0x48] sm:$0xff] %v837_v39  ;;  %v838_v42 = vpack.c.bf16 %v635_v40, %v634_v34  ;;  %v839_v43 = vpack.c.bf16 %v637_v41, %v636_v35 }
 0x144   :  { %752 = vst [vmem:[#allocation9 + $0x50] sm:$0xff] %v838_v42  ;;  %753 = vst [vmem:[#allocation9 + $0x58] sm:$0xff] %v839_v43  ;;  %v411_v48 = vpop.f32.mrb[12].mxu0  ;;  %v484_v49 = vpop.f32.mrb[12].mxu1 }
 0x145   :  { %v638_v50 = vadd.f32 %v1075_v44, %v411_v48  ;;  %v640_v51 = vadd.f32 %v1077_v45, %v484_v49  ;;  %v413_v52 = vpop.f32.mrb[13].mxu0  ;;  %v486_v53 = vpop.f32.mrb[13].mxu1 }
 0x146   :  { %v639_v54 = vadd.f32 %v1079_v46, %v413_v52  ;;  %v641_v55 = vadd.f32 %v1081_v47, %v486_v53  ;;  %v415_v56 = vpop.f32.mrb[14].mxu0  ;;  %v488_v57 = vpop.f32.mrb[14].mxu1 }
 0x147   :  { %v642_v58 = vadd.f32 %v1075_v44, %v415_v56  ;;  %v644_v59 = vadd.f32 %v1077_v45, %v488_v57  ;;  %v417_v60 = vpop.f32.mrb[15].mxu0  ;;  %v490_v61 = vpop.f32.mrb[15].mxu1 }
 0x148   :  { %v840_v62 = vpack.c.bf16 %v639_v54, %v638_v50  ;;  %v841_v63 = vpack.c.bf16 %v641_v55, %v640_v51  ;;  %v643_v0 = vadd.f32 %v1079_v46, %v417_v60  ;;  %v645_v1 = vadd.f32 %v1081_v47, %v490_v61 }
 0x14a   :  { %754 = vst [vmem:[#allocation9 + $0x60] sm:$0xff] %v840_v62  ;;  %755 = vst [vmem:[#allocation9 + $0x68] sm:$0xff] %v841_v63  ;;  %v842_v2 = vpack.c.bf16 %v643_v0, %v642_v58  ;;  %v843_v3 = vpack.c.bf16 %v645_v1, %v644_v59 }
 0x14c   :  { %756 = vst [vmem:[#allocation9 + $0x70] sm:$0xff] %v842_v2  ;;  %757 = vst [vmem:[#allocation9 + $0x78] sm:$0xff] %v843_v3 }
 0x14d   :  { %982 = shalt.err (!%p979_p0)
}
 0x14e   :  { %s983_s29 = scalar_lea.hbm %s1133_s3, 2048 }
 0x14f   :  { %p984_p1 = scmp.ne.s32.totalorder %s1133_s3, %s983_s29  ;;  %p987_p2 = scmp.lt.u32.totalorder %s983_s29, %s1133_s3 }
 0x151   :  { %p989_p3 = pnand %p987_p2, %p984_p1 }
 0x153   :  { %992 = shalt.err (!%p989_p3)
}
 0x154   :  { %769 = dma.vmem_to_hbm [thread:$0]  %s764_s25, 2048, %s1133_s3, [#allocation5], %s1000_s22, %s1000_s22, %s1001_s23  }
 0x155   :  { %997 = dma.done.wait [#allocation5], 2048  }
 0x156   :  { %998 = vsyncadd [#allocation5], 4294965248 }
 0x157   :  { %773 = vsyncpa [#allocation4], 1 }
 0x158   :  { %774 = vsyncpa [#allocation7], 1 }
 0x159   :  { %775 = vsyncpa [#allocation5], 1 }

// kernel: char_lstm_forward.4
= control target key start
LH: loop header
LB: loop body
LE: loop exit
PB: predicated region body
PF: predicated region fallthrough
CT: control target
= control target key end

     0   :  { %10 = vsyncpa [#allocation5], 0  ;;  %s3818_s0 = inlined_call_operand.hbm [shape: bf16[8,8,512], index: 0, kind: input, shape index: {}]   ;;  %s3819_s1 = inlined_call_operand.hbm [shape: bf16[128,512], index: 1, kind: input, shape index: {}]   ;;  %s3820_s2 = inlined_call_operand.hbm [shape: bf16[8,8,128], index: 2, kind: output, shape index: {0}]   ;;  %s3821_s3 = inlined_call_operand.hbm [shape: f32[8,128], index: 3, kind: output, shape index: {1}]   ;;  %s3822_s4 = inlined_call_operand.hbm [shape: f32[8,128], index: 4, kind: output, shape index: {2}]  }
   0x1   :  { %11 = vsyncpa [#allocation8], 0 }
   0x2   :  { %12 = vsyncpa [#allocation6], 0 }
   0x3   :  { %13 = vsyncpa [#allocation11], 0  ;;  %s3284_s15 = smov [#allocation4]   ;;  %s3166_s19 = scalar_lea.hbm %s3818_s0, 2048 }
   0x4   :  { %s19_s16 = sshll.u32 %s3284_s15, 4  ;;  %p3167_p0 = scmp.ne.s32.totalorder %s3818_s0, %s3166_s19  ;;  %s20_s16 = int_to_ptr.vmem [resolvable:$true] %s19_s16 }
   0x5   :  { %p3170_p1 = scmp.lt.u32.totalorder %s3166_s19, %s3818_s0 }
   0x7   :  { %p3172_p2 = pnand %p3170_p1, %p3167_p0 }
   0x9   :  { %3175 = shalt.err (!%p3172_p2)
}
   0xa   :  { %s3176_s24 = scalar_lea.vmem %s20_s16, 2048  ;;  %p3181_p4 = scmp.lt.s32.totalorder %s20_s16, %s20_s16 }
   0xb   :  { %p3177_p3 = scmp.ne.s32.totalorder %s20_s16, %s3176_s24  ;;  %p3182_p5 = scmp.lt.s32.totalorder %s3176_s24, %s3176_s24 }
   0xd   :  { %p3183_p6 = por %p3182_p5, %p3181_p4 }
   0xf   :  { %p3184_p7 = pnand %p3183_p6, %p3177_p3 }
  0x11   :  { %3187 = shalt.err (!%p3184_p7)
}
  0x12   :  { %s3285_s25 = smov 256   ;;  %s3286_s26 = smov 16  }
  0x13   :  { %25 = dma.hbm_to_vmem [thread:$0]  %s3818_s0, 2048, %s20_s16, [#allocation5], %s3285_s25, %s3285_s25, %s3286_s26  }
  0x14   :  { %s3287_s29 = smov [#allocation7]   ;;  %s3188_s7 = scalar_lea.hbm %s3819_s1, 4096 }
  0x15   :  { %s31_s30 = sshll.u32 %s3287_s29, 4  ;;  %p3189_p8 = scmp.ne.s32.totalorder %s3819_s1, %s3188_s7  ;;  %s32_s30 = int_to_ptr.vmem [resolvable:$true] %s31_s30 }
  0x16   :  { %p3192_p9 = scmp.lt.u32.totalorder %s3188_s7, %s3819_s1 }
  0x18   :  { %p3194_p10 = pnand %p3192_p9, %p3189_p8 }
  0x1a   :  { %3197 = shalt.err (!%p3194_p10)
}
  0x1b   :  { %s3198_s12 = scalar_lea.vmem %s32_s30, 4096  ;;  %p3203_p12 = scmp.lt.s32.totalorder %s32_s30, %s32_s30 }
  0x1c   :  { %p3199_p11 = scmp.ne.s32.totalorder %s32_s30, %s3198_s12  ;;  %p3204_p13 = scmp.lt.s32.totalorder %s3198_s12, %s3198_s12 }
  0x1e   :  { %p3205_p0 = por %p3204_p13, %p3203_p12 }
  0x20   :  { %p3206_p1 = pnand %p3205_p0, %p3199_p11 }
  0x22   :  { %3209 = shalt.err (!%p3206_p1)
}
  0x23   :  { %37 = dma.hbm_to_vmem [thread:$0]  %s3819_s1, 4096, %s32_s30, [#allocation8], %s3285_s25, %s3285_s25, %s3286_s26  }
  0x24   :  { %3276 = dma.done.wait [#allocation5], 2048  }
  0x25   :  { %3277 = vsyncadd [#allocation5], 4294965248 }
  0x26   :  { %3278 = dma.done.wait [#allocation8], 4096  }
  0x27   :  { %3279 = vsyncadd [#allocation8], 4294963200  ;;  %v3288_v0 = vmov 0   ;;  %v3346_v1 = vld [vmem:[#allocation7 + $0x4] ss:$16 sps:$4 sm:$0xff]   ;;  %v3289_v33 = vmov 0.0|0.0  }
  0x28   :  { %284 = vmatprep.mubr.bf16.mxu0 %v3288_v0  ;;  %325 = vmatprep.mubr.bf16.mxu1 %v3288_v0  ;;  %v3348_v2 = vld [vmem:[#allocation7] ss:$16 sps:$4 sm:$0xff]   ;;  %v3351_v3 = vld [vmem:[#allocation7 + $0x24] ss:$16 sps:$4 sm:$0xff]   ;;  %v3359_v6 = vld [vmem:[#allocation7 + $0xc] ss:$16 sps:$4 sm:$0xff]  }
  0x29   :  { %252 = vmatprep.subr.bf16.mxu0 %v3346_v1  ;;  %v3354_v4 = vld [vmem:[#allocation7 + $0x20] ss:$16 sps:$4 sm:$0xff]   ;;  %v3357_v5 = vld [vmem:[#allocation7 + $0x44] ss:$16 sps:$4 sm:$0xff]   ;;  %v3361_v7 = vld [vmem:[#allocation7 + $0x8] ss:$16 sps:$4 sm:$0xff]   ;;  %293 = vmatprep.subr.bf16.mxu1 %v3359_v6 }
  0x2a   :  { %253 = vmatpush1.bf16.msra.mxu0 %v3348_v2  ;;  %v3364_v8 = vld [vmem:[#allocation7 + $0x40] ss:$16 sps:$4 sm:$0xff]   ;;  %v3368_v9 = vld [vmem:[#allocation7 + $0x64] ss:$16 sps:$4 sm:$0xff]   ;;  %294 = vmatpush1.bf16.msra.mxu1 %v3361_v7  ;;  %v3371_v10 = vld [vmem:[#allocation7 + $0x2c] ss:$16 sps:$4 sm:$0xff]  }
  0x2b   :  { %254 = vmatprep.subr.bf16.mxu0 %v3351_v3  ;;  %v3373_v11 = vld [vmem:[#allocation7 + $0x28] ss:$16 sps:$4 sm:$0xff]   ;;  %295 = vmatprep.subr.bf16.mxu1 %v3371_v10  ;;  %v3377_v12 = vld [vmem:[#allocation7 + $0x60] ss:$16 sps:$4 sm:$0xff]   ;;  %v3379_v13 = vld [vmem:[#allocation7 + $0x84] ss:$16 sps:$4 sm:$0xff]  }
  0x2c   :  { %v3381_v14 = vld [vmem:[#allocation7 + $0x4c] ss:$16 sps:$4 sm:$0xff]   ;;  %v3385_v15 = vld [vmem:[#allocation7 + $0x48] ss:$16 sps:$4 sm:$0xff]   ;;  %v3391_v17 = vld [vmem:[#allocation7 + $0x80] ss:$16 sps:$4 sm:$0xff]  }
  0x2d   :  { %v3388_v16 = vld [vmem:[#allocation7 + $0x6c] ss:$16 sps:$4 sm:$0xff]   ;;  %v3394_v18 = vld [vmem:[#allocation7 + $0xa4] ss:$16 sps:$4 sm:$0xff]   ;;  %v3397_v19 = vld [vmem:[#allocation7 + $0x68] ss:$16 sps:$4 sm:$0xff]  }
  0x2e   :  { %255 = vmatpush1.bf16.msra.mxu0 %v3354_v4  ;;  %296 = vmatpush1.bf16.msra.mxu1 %v3373_v11  ;;  %v3400_v20 = vld [vmem:[#allocation7 + $0x8c] ss:$16 sps:$4 sm:$0xff]   ;;  %v3403_v21 = vld [vmem:[#allocation7 + $0xa0] ss:$16 sps:$4 sm:$0xff]   ;;  %v3405_v22 = vld [vmem:[#allocation7 + $0xc4] ss:$16 sps:$4 sm:$0xff]  }
  0x2f   :  { %256 = vmatprep.subr.bf16.mxu0 %v3357_v5  ;;  %297 = vmatprep.subr.bf16.mxu1 %v3381_v14  ;;  %v3409_v23 = vld [vmem:[#allocation7 + $0x88] ss:$16 sps:$4 sm:$0xff]   ;;  %v3411_v24 = vld [vmem:[#allocation7 + $0xc0] ss:$16 sps:$4 sm:$0xff]   ;;  %v3414_v25 = vld [vmem:[#allocation7 + $0xac] ss:$16 sps:$4 sm:$0xff]  }
  0x30   :  { %v3416_v26 = vld [vmem:[#allocation7 + $0xe4] ss:$16 sps:$4 sm:$0xff]   ;;  %v3418_v27 = vld [vmem:[#allocation7 + $0xa8] ss:$16 sps:$4 sm:$0xff]   ;;  %v3421_v28 = vld [vmem:[#allocation7 + $0xcc] ss:$16 sps:$4 sm:$0xff]  }
  0x31   :  { %v3425_v29 = vld [vmem:[#allocation7 + $0xe0] ss:$16 sps:$4 sm:$0xff]   ;;  %v3428_v30 = vld [vmem:[#allocation7 + $0xc8] ss:$16 sps:$4 sm:$0xff]   ;;  %v3431_v31 = vld [vmem:[#allocation7 + $0xec] ss:$16 sps:$4 sm:$0xff]  }
  0x32   :  { %257 = vmatpush1.bf16.msra.mxu0 %v3364_v8  ;;  %298 = vmatpush1.bf16.msra.mxu1 %v3385_v15  ;;  %v3438_v32 = vld [vmem:[#allocation7 + $0xe8] ss:$16 sps:$4 sm:$0xff]   ;;  %v53_v34 = vld [vmem:[#allocation4] sm:$0xff]  ;;  %s3290_s1 = smov [#allocation10]   ;;  %s3291_s15 = smov [#allocation9]  }
  0x33   :  { %258 = vmatprep.subr.bf16.mxu0 %v3368_v9  ;;  %299 = vmatprep.subr.bf16.mxu1 %v3388_v16  ;;  %v55_v35 = vunpack.c.l.bf16 %v53_v34  ;;  %v56_v36 = vunpack.c.h.bf16 %v53_v34  ;;  %v54_v38 = vld [vmem:[#allocation4 + $0x8] sm:$0xff]  ;;  %s2624_s14 = sshll.u32 %s3290_s1, 4  ;;  %s2611_s16 = sshll.u32 %s3291_s15, 4  ;;  %s2625_s14 = int_to_ptr.vmem [resolvable:$true] %s2624_s14  ;;  %s3768_s16 = int_to_ptr.vmem [resolvable:$true] %s2611_s16 }
  0x34   :  { %v58_v45 = vunpack.c.h.bf16 %v54_v38  ;;  %v57_v51 = vunpack.c.l.bf16 %v54_v38  ;;  %s3292_s17 = smov [#allocation12]   ;;  %s3210_s19 = scalar_lea.vmem %s2625_s14, 128 }
  0x35   :  { %s2634_s18 = sshll.u32 %s3292_s17, 4  ;;  %p3211_p2 = scmp.ne.s32.totalorder %s2625_s14, %s3210_s19  ;;  %s3770_s18 = int_to_ptr.vmem [resolvable:$true] %s2634_s18 }
  0x36   :  { %259 = vmatpush1.bf16.msra.mxu0 %v3377_v12  ;;  %300 = vmatpush1.bf16.msra.mxu1 %v3397_v19  ;;  %p3215_p3 = scmp.lt.s32.totalorder %s2625_s14, %s2625_s14  ;;  %p3216_p4 = scmp.lt.s32.totalorder %s3210_s19, %s3210_s19 }
  0x37   :  { %260 = vmatprep.subr.bf16.mxu0 %v3379_v13  ;;  %301 = vmatprep.subr.bf16.mxu1 %v3400_v20 }
  0x38   :  { %p3217_p5 = por %p3216_p4, %p3215_p3 }
  0x3a   :  { %261 = vmatpush1.bf16.msra.mxu0 %v3391_v17  ;;  %302 = vmatpush1.bf16.msra.mxu1 %v3409_v23  ;;  %p3218_p6 = pnand %p3217_p5, %p3211_p2 }
  0x3b   :  { %262 = vmatprep.subr.bf16.mxu0 %v3394_v18  ;;  %303 = vmatprep.subr.bf16.mxu1 %v3414_v25 }
  0x3e   :  { %263 = vmatpush1.bf16.msra.mxu0 %v3403_v21  ;;  %304 = vmatpush1.bf16.msra.mxu1 %v3418_v27 }
  0x3f   :  { %264 = vmatprep.subr.bf16.mxu0 %v3405_v22  ;;  %305 = vmatprep.subr.bf16.mxu1 %v3421_v28 }
  0x42   :  { %265 = vmatpush1.bf16.msra.mxu0 %v3411_v24  ;;  %306 = vmatpush1.bf16.msra.mxu1 %v3428_v30 }
  0x43   :  { %266 = vmatprep.subr.bf16.mxu0 %v3416_v26  ;;  %307 = vmatprep.subr.bf16.mxu1 %v3431_v31 }
  0x46   :  { %267 = vmatpush1.bf16.msra.mxu0 %v3425_v29  ;;  %308 = vmatpush1.bf16.msra.mxu1 %v3438_v32 }
  0x47   :  { %570 = vmatprep.subr.bf16.mxu0 %v3346_v1  ;;  %611 = vmatprep.subr.bf16.mxu1 %v3359_v6 }
  0x49   :  { %285 = vmatmul.mubr.bf16.vlgmr.msra.gmra.mrb[0].mxu0 %v3289_v33  ;;  %326 = vmatmul.mubr.bf16.vlgmr.msra.gmra.mrb[0].mxu1 %v3289_v33 }
  0x4a   :  { %571 = vmatpush1.bf16.msra.mxu0 %v3348_v2  ;;  %602 = vmatprep.mubr.bf16.mxu0 %v3288_v0 }
  0x4b   :  { %572 = vmatprep.subr.bf16.mxu0 %v3351_v3  ;;  %612 = vmatpush1.bf16.msra.mxu1 %v3361_v7 }
  0x4c   :  { %613 = vmatprep.subr.bf16.mxu1 %v3371_v10  ;;  %643 = vmatprep.mubr.bf16.mxu1 %v3288_v0 }
  0x4e   :  { %573 = vmatpush1.bf16.msra.mxu0 %v3354_v4 }
  0x4f   :  { %574 = vmatprep.subr.bf16.mxu0 %v3357_v5  ;;  %614 = vmatpush1.bf16.msra.mxu1 %v3373_v11 }
  0x50   :  { %615 = vmatprep.subr.bf16.mxu1 %v3381_v14 }
  0x52   :  { %575 = vmatpush1.bf16.msra.mxu0 %v3364_v8 }
  0x53   :  { %576 = vmatprep.subr.bf16.mxu0 %v3368_v9  ;;  %616 = vmatpush1.bf16.msra.mxu1 %v3385_v15 }
  0x54   :  { %617 = vmatprep.subr.bf16.mxu1 %v3388_v16 }
  0x56   :  { %577 = vmatpush1.bf16.msra.mxu0 %v3377_v12 }
  0x57   :  { %578 = vmatprep.subr.bf16.mxu0 %v3379_v13  ;;  %618 = vmatpush1.bf16.msra.mxu1 %v3397_v19 }
  0x58   :  { %619 = vmatprep.subr.bf16.mxu1 %v3400_v20 }
  0x5a   :  { %579 = vmatpush1.bf16.msra.mxu0 %v3391_v17 }
  0x5b   :  { %580 = vmatprep.subr.bf16.mxu0 %v3394_v18  ;;  %620 = vmatpush1.bf16.msra.mxu1 %v3409_v23 }
  0x5c   :  { %621 = vmatprep.subr.bf16.mxu1 %v3414_v25 }
  0x5e   :  { %581 = vmatpush1.bf16.msra.mxu0 %v3403_v21 }
  0x5f   :  { %582 = vmatprep.subr.bf16.mxu0 %v3405_v22  ;;  %622 = vmatpush1.bf16.msra.mxu1 %v3418_v27 }
  0x60   :  { %623 = vmatprep.subr.bf16.mxu1 %v3421_v28 }
  0x62   :  { %583 = vmatpush1.bf16.msra.mxu0 %v3411_v24 }
  0x63   :  { %584 = vmatprep.subr.bf16.mxu0 %v3416_v26  ;;  %624 = vmatpush1.bf16.msra.mxu1 %v3428_v30 }
  0x64   :  { %625 = vmatprep.subr.bf16.mxu1 %v3431_v31 }
  0x66   :  { %585 = vmatpush1.bf16.msra.mxu0 %v3425_v29 }
  0x67   :  { %889 = vmatprep.subr.bf16.mxu0 %v3346_v1  ;;  %626 = vmatpush1.bf16.msra.mxu1 %v3438_v32 }
  0x68   :  { %930 = vmatprep.subr.bf16.mxu1 %v3359_v6 }
 0x11c   :  { %v286_v37 = vpop.f32.mrb[0].mxu0  ;;  %v327_v47 = vpop.f32.mrb[0].mxu1 }
 0x11d   :  { %v334_v39 = vadd.f32 %v286_v37, %v55_v35  ;;  %v288_v40 = vpop.f32.mrb[1].mxu0  ;;  %v329_v48 = vpop.f32.mrb[1].mxu1  ;;  %v336_v54 = vadd.f32 %v327_v47, %v57_v51 }
 0x11e   :  { %v335_v41 = vadd.f32 %v288_v40, %v56_v36  ;;  %v290_v42 = vpop.f32.mrb[2].mxu0  ;;  %v337_v49 = vadd.f32 %v329_v48, %v58_v45  ;;  %v331_v50 = vpop.f32.mrb[2].mxu1  ;;  %v372_v40 = vld [vmem:[#allocation4 + $0x10] sm:$0xff] }
 0x11f   :  { %v2683_v43 = vmul.f32 -1.442695, %v334_v39  ;;  %v291_v44 = vpop.f32.mrb[3].mxu0  ;;  %v332_v52 = vpop.f32.mrb[3].mxu1  ;;  %v375_v42 = vunpack.c.h.bf16 %v372_v40 }
 0x120   :  { %v2684_v46 = vmul.f32 -1.442695, %v335_v41  ;;  %v2685_v53 = vmul.f32 -1.442695, %v337_v49  ;;  %v374_v41 = vunpack.c.l.bf16 %v372_v40 }
 0x121   :  { %3038 = vpow2.f32 %v2683_v43 }
 0x122   :  { %3040 = vpow2.f32 %v2684_v46  ;;  %v373_v46 = vld [vmem:[#allocation4 + $0x18] sm:$0xff] }
 0x123   :  { %3042 = vpow2.f32 %v2685_v53 }
 0x124   :  { %3044 = vtanh.f32 %v336_v54 }
 0x12b   :  { %v3039_v55 = vpop.eup %3038 }
 0x12c   :  { %v3041_v56 = vpop.eup %3040  ;;  %v341_v57 = vadd.f32 1.0, %v3039_v55 }
 0x12d   :  { %v347_v58 = vadd.f32 1.0, %v3041_v56  ;;  %v3043_v59 = vpop.eup %3042  ;;  %v377_v56 = vunpack.c.h.bf16 %v373_v46 }
 0x12e   :  { %3046 = vrcp.f32 %v341_v57  ;;  %v3045_v60 = vpop.eup %3044  ;;  %v354_v62 = vadd.f32 1.0, %v3043_v59 }
 0x12f   :  { %3048 = vrcp.f32 %v347_v58 }
 0x130   :  { %3050 = vrcp.f32 %v354_v62 }
 0x138   :  { %v3047_v61 = vpop.eup %3046 }
 0x139   :  { %v3049_v63 = vpop.eup %3048  ;;  %v358_v33 = vmul.f32 %v3047_v61, %v3045_v60 }
 0x13a   :  { %v357_v34 = vmul.f32 0.0, %v3049_v63  ;;  %v3051_v36 = vpop.eup %3050 }
 0x13c   :  { %v3478_v35 = vadd.f32 %v358_v33, %v357_v34 }
 0x13e   :  { %3052 = vtanh.f32 %v3478_v35 }
 0x148   :  { %v3053_v37 = vpop.eup %3052 }
 0x149   :  { %v361_v38 = vmul.f32 %v3053_v37, %v3051_v36 }
 0x14b   :  { %v362_v39 = vpack.c.bf16 %v361_v38, %v361_v38 }
 0x14d   :  { %363 = vst [vmem:[#allocation9] sm:$0xf] %v362_v39  ;;  %603 = vmatmul.mubr.bf16.vlgmr.msra.gmra.mrb[4].mxu0 %v362_v39  ;;  %644 = vmatmul.mubr.bf16.vlgmr.msra.gmra.mrb[4].mxu1 %v362_v39 }
 0x14e   :  { %890 = vmatpush1.bf16.msra.mxu0 %v3348_v2  ;;  %931 = vmatpush1.bf16.msra.mxu1 %v3361_v7 }
 0x14f   :  { %891 = vmatprep.subr.bf16.mxu0 %v3351_v3  ;;  %932 = vmatprep.subr.bf16.mxu1 %v3371_v10 }
 0x150   :  { %921 = vmatprep.mubr.bf16.mxu0 %v3288_v0  ;;  %962 = vmatprep.mubr.bf16.mxu1 %v3288_v0 }
 0x152   :  { %892 = vmatpush1.bf16.msra.mxu0 %v3354_v4  ;;  %933 = vmatpush1.bf16.msra.mxu1 %v3373_v11 }
 0x153   :  { %893 = vmatprep.subr.bf16.mxu0 %v3357_v5  ;;  %934 = vmatprep.subr.bf16.mxu1 %v3381_v14 }
 0x156   :  { %894 = vmatpush1.bf16.msra.mxu0 %v3364_v8  ;;  %935 = vmatpush1.bf16.msra.mxu1 %v3385_v15 }
 0x157   :  { %895 = vmatprep.subr.bf16.mxu0 %v3368_v9  ;;  %936 = vmatprep.subr.bf16.mxu1 %v3388_v16 }
 0x15a   :  { %896 = vmatpush1.bf16.msra.mxu0 %v3377_v12  ;;  %937 = vmatpush1.bf16.msra.mxu1 %v3397_v19 }
 0x15b   :  { %897 = vmatprep.subr.bf16.mxu0 %v3379_v13  ;;  %938 = vmatprep.subr.bf16.mxu1 %v3400_v20 }
 0x15e   :  { %898 = vmatpush1.bf16.msra.mxu0 %v3391_v17  ;;  %939 = vmatpush1.bf16.msra.mxu1 %v3409_v23 }
 0x15f   :  { %899 = vmatprep.subr.bf16.mxu0 %v3394_v18  ;;  %940 = vmatprep.subr.bf16.mxu1 %v3414_v25 }
 0x162   :  { %900 = vmatpush1.bf16.msra.mxu0 %v3403_v21  ;;  %941 = vmatpush1.bf16.msra.mxu1 %v3418_v27 }
 0x163   :  { %901 = vmatprep.subr.bf16.mxu0 %v3405_v22  ;;  %942 = vmatprep.subr.bf16.mxu1 %v3421_v28 }
 0x166   :  { %902 = vmatpush1.bf16.msra.mxu0 %v3411_v24  ;;  %943 = vmatpush1.bf16.msra.mxu1 %v3428_v30 }
 0x167   :  { %903 = vmatprep.subr.bf16.mxu0 %v3416_v26  ;;  %944 = vmatprep.subr.bf16.mxu1 %v3431_v31 }
 0x16a   :  { %904 = vmatpush1.bf16.msra.mxu0 %v3425_v29  ;;  %945 = vmatpush1.bf16.msra.mxu1 %v3438_v32 }
 0x16b   :  { %1208 = vmatprep.subr.bf16.mxu0 %v3346_v1  ;;  %1249 = vmatprep.subr.bf16.mxu1 %v3359_v6  ;;  %v376_v6 = vunpack.c.l.bf16 %v373_v46 }
 0x220   :  { %v604_v43 = vpop.f32.mrb[4].mxu0  ;;  %v645_v44 = vpop.f32.mrb[4].mxu1 }
 0x221   :  { %v652_v45 = vadd.f32 %v604_v43, %v374_v41  ;;  %v606_v47 = vpop.f32.mrb[5].mxu0  ;;  %v647_v48 = vpop.f32.mrb[5].mxu1  ;;  %v654_v58 = vadd.f32 %v645_v44, %v376_v6  ;;  %v3575_v6 = vld [vmem:[#allocation7 + $0x28] ss:$16 sps:$4 sm:$0xff]  }
 0x222   :  { %v653_v49 = vadd.f32 %v606_v47, %v375_v42  ;;  %v608_v50 = vpop.f32.mrb[6].mxu0  ;;  %v649_v51 = vpop.f32.mrb[6].mxu1  ;;  %v655_v1 = vadd.f32 %v647_v48, %v377_v56  ;;  %v3571_v56 = vld [vmem:[#allocation7 + $0x2c] ss:$16 sps:$4 sm:$0xff]  }
 0x223   :  { %v2718_v52 = vmul.f32 -1.442695, %v652_v45  ;;  %v609_v53 = vpop.f32.mrb[7].mxu0  ;;  %v650_v54 = vpop.f32.mrb[7].mxu1  ;;  %v3557_v51 = vld [vmem:[#allocation7 + $0x4] ss:$16 sps:$4 sm:$0xff]  }
 0x224   :  { %v2719_v55 = vmul.f32 -1.442695, %v653_v49  ;;  %v2720_v57 = vmul.f32 -1.442695, %v655_v1  ;;  %v3561_v53 = vld [vmem:[#allocation7] ss:$16 sps:$4 sm:$0xff]  }
 0x225   :  { %3054 = vpow2.f32 %v2718_v52  ;;  %v3559_v52 = vld [vmem:[#allocation7 + $0xc] ss:$16 sps:$4 sm:$0xff]   ;;  %v3563_v54 = vld [vmem:[#allocation7 + $0x8] ss:$16 sps:$4 sm:$0xff]   ;;  %v3573_v1 = vld [vmem:[#allocation7 + $0x20] ss:$16 sps:$4 sm:$0xff]  }
 0x226   :  { %3056 = vpow2.f32 %v2719_v55  ;;  %v3569_v55 = vld [vmem:[#allocation7 + $0x24] ss:$16 sps:$4 sm:$0xff]  }
 0x227   :  { %3058 = vpow2.f32 %v2720_v57  ;;  %v3581_v57 = vld [vmem:[#allocation7 + $0x44] ss:$16 sps:$4 sm:$0xff]  }
 0x228   :  { %3060 = vtanh.f32 %v654_v58  ;;  %v3583_v58 = vld [vmem:[#allocation7 + $0x4c] ss:$16 sps:$4 sm:$0xff]  }
 0x22f   :  { %v3055_v59 = vpop.eup %3054 }
 0x230   :  { %v3057_v60 = vpop.eup %3056  ;;  %v659_v61 = vadd.f32 1.0, %v3055_v59  ;;  %v3585_v59 = vld [vmem:[#allocation7 + $0x40] ss:$16 sps:$4 sm:$0xff]  }
 0x231   :  { %v665_v62 = vadd.f32 1.0, %v3057_v60  ;;  %v3059_v63 = vpop.eup %3058  ;;  %v3587_v60 = vld [vmem:[#allocation7 + $0x48] ss:$16 sps:$4 sm:$0xff]  }
 0x232   :  { %3062 = vrcp.f32 %v659_v61  ;;  %v3061_v33 = vpop.eup %3060  ;;  %v672_v38 = vadd.f32 1.0, %v3059_v63  ;;  %v3593_v61 = vld [vmem:[#allocation7 + $0x64] ss:$16 sps:$4 sm:$0xff]   ;;  %v3597_v63 = vld [vmem:[#allocation7 + $0x60] ss:$16 sps:$4 sm:$0xff]  }
 0x233   :  { %3064 = vrcp.f32 %v665_v62  ;;  %v3595_v62 = vld [vmem:[#allocation7 + $0x6c] ss:$16 sps:$4 sm:$0xff]  }
 0x234   :  { %3066 = vrcp.f32 %v672_v38  ;;  %v3611_v38 = vld [vmem:[#allocation7 + $0x8c] ss:$16 sps:$4 sm:$0xff]  }
 0x23c   :  { %v3063_v34 = vpop.eup %3062 }
 0x23d   :  { %v3065_v36 = vpop.eup %3064  ;;  %v676_v37 = vmul.f32 %v3063_v34, %v3061_v33  ;;  %v3599_v33 = vld [vmem:[#allocation7 + $0x68] ss:$16 sps:$4 sm:$0xff]   ;;  %v3605_v34 = vld [vmem:[#allocation7 + $0x80] ss:$16 sps:$4 sm:$0xff]  }
 0x23e   :  { %v675_v39 = vmul.f32 %v3065_v36, %v3478_v35  ;;  %v3067_v41 = vpop.eup %3066  ;;  %v3607_v36 = vld [vmem:[#allocation7 + $0x84] ss:$16 sps:$4 sm:$0xff]  }
 0x240   :  { %v3516_v40 = vadd.f32 %v676_v37, %v675_v39  ;;  %v3609_v37 = vld [vmem:[#allocation7 + $0x88] ss:$16 sps:$4 sm:$0xff]   ;;  %v3613_v39 = vld [vmem:[#allocation7 + $0xa4] ss:$16 sps:$4 sm:$0xff]  }
 0x242   :  { %3068 = vtanh.f32 %v3516_v40 }
 0x24c   :  { %v3069_v42 = vpop.eup %3068 }
 0x24d   :  { %v679_v43 = vmul.f32 %v3069_v42, %v3067_v41  ;;  %v3620_v41 = vld [vmem:[#allocation7 + $0xa0] ss:$16 sps:$4 sm:$0xff]   ;;  %v3624_v42 = vld [vmem:[#allocation7 + $0xa8] ss:$16 sps:$4 sm:$0xff]  }
 0x24f   :  { %v680_v44 = vpack.c.bf16 %v679_v43, %v679_v43  ;;  %v3626_v43 = vld [vmem:[#allocation7 + $0xc4] ss:$16 sps:$4 sm:$0xff]  }
 0x251   :  { %682 = vst [vmem:[#allocation9 + $0x4] sm:$0xf] %v680_v44  ;;  %922 = vmatmul.mubr.bf16.vlgmr.msra.gmra.mrb[8].mxu0 %v680_v44  ;;  %963 = vmatmul.mubr.bf16.vlgmr.msra.gmra.mrb[8].mxu1 %v680_v44  ;;  %v3629_v44 = vld [vmem:[#allocation7 + $0xcc] ss:$16 sps:$4 sm:$0xff]  }
 0x252   :  { %1209 = vmatpush1.bf16.msra.mxu0 %v3348_v2  ;;  %1250 = vmatpush1.bf16.msra.mxu1 %v3361_v7  ;;  %v691_v2 = vld [vmem:[#allocation4 + $0x20] sm:$0xff] }
 0x253   :  { %1210 = vmatprep.subr.bf16.mxu0 %v3351_v3  ;;  %1251 = vmatprep.subr.bf16.mxu1 %v3371_v10  ;;  %v693_v3 = vunpack.c.l.bf16 %v691_v2 }
 0x254   :  { %1240 = vmatprep.mubr.bf16.mxu0 %v3288_v0  ;;  %1281 = vmatprep.mubr.bf16.mxu1 %v3288_v0 }
 0x256   :  { %1211 = vmatpush1.bf16.msra.mxu0 %v3354_v4  ;;  %1252 = vmatpush1.bf16.msra.mxu1 %v3373_v11  ;;  %v694_v4 = vunpack.c.h.bf16 %v691_v2  ;;  %v3632_v2 = vld [vmem:[#allocation7 + $0xc0] ss:$16 sps:$4 sm:$0xff]  }
 0x257   :  { %1212 = vmatprep.subr.bf16.mxu0 %v3357_v5  ;;  %1253 = vmatprep.subr.bf16.mxu1 %v3381_v14 }
 0x25a   :  { %1213 = vmatpush1.bf16.msra.mxu0 %v3364_v8  ;;  %1254 = vmatpush1.bf16.msra.mxu1 %v3385_v15 }
 0x25b   :  { %1214 = vmatprep.subr.bf16.mxu0 %v3368_v9  ;;  %1255 = vmatprep.subr.bf16.mxu1 %v3388_v16  ;;  %v692_v9 = vld [vmem:[#allocation4 + $0x28] sm:$0xff] }
 0x25e   :  { %1215 = vmatpush1.bf16.msra.mxu0 %v3377_v12  ;;  %1256 = vmatpush1.bf16.msra.mxu1 %v3397_v19  ;;  %v696_v19 = vunpack.c.h.bf16 %v692_v9 }
 0x25f   :  { %1216 = vmatprep.subr.bf16.mxu0 %v3379_v13  ;;  %1257 = vmatprep.subr.bf16.mxu1 %v3400_v20 }
 0x262   :  { %1217 = vmatpush1.bf16.msra.mxu0 %v3391_v17  ;;  %1258 = vmatpush1.bf16.msra.mxu1 %v3409_v23 }
 0x263   :  { %1218 = vmatprep.subr.bf16.mxu0 %v3394_v18  ;;  %1259 = vmatprep.subr.bf16.mxu1 %v3414_v25 }
 0x266   :  { %1219 = vmatpush1.bf16.msra.mxu0 %v3403_v21  ;;  %1260 = vmatpush1.bf16.msra.mxu1 %v3418_v27  ;;  %v695_v21 = vunpack.c.l.bf16 %v692_v9  ;;  %v1010_v9 = vld [vmem:[#allocation4 + $0x30] sm:$0xff] }
 0x267   :  { %1220 = vmatprep.subr.bf16.mxu0 %v3405_v22  ;;  %1261 = vmatprep.subr.bf16.mxu1 %v3421_v28 }
 0x26a   :  { %1221 = vmatpush1.bf16.msra.mxu0 %v3411_v24  ;;  %1262 = vmatpush1.bf16.msra.mxu1 %v3428_v30 }
 0x26b   :  { %1222 = vmatprep.subr.bf16.mxu0 %v3416_v26  ;;  %1263 = vmatprep.subr.bf16.mxu1 %v3431_v31 }
 0x26e   :  { %1223 = vmatpush1.bf16.msra.mxu0 %v3425_v29  ;;  %1264 = vmatpush1.bf16.msra.mxu1 %v3438_v32 }
 0x26f   :  { %1527 = vmatprep.subr.bf16.mxu0 %v3557_v51  ;;  %1568 = vmatprep.subr.bf16.mxu1 %v3559_v52 }
 0x324   :  { %v923_v5 = vpop.f32.mrb[8].mxu0  ;;  %v964_v7 = vpop.f32.mrb[8].mxu1 }
 0x325   :  { %v971_v8 = vadd.f32 %v923_v5, %v693_v3  ;;  %v925_v10 = vpop.f32.mrb[9].mxu0  ;;  %v966_v11 = vpop.f32.mrb[9].mxu1  ;;  %v973_v23 = vadd.f32 %v964_v7, %v695_v21  ;;  %v3636_v3 = vld [vmem:[#allocation7 + $0xc8] ss:$16 sps:$4 sm:$0xff]   ;;  %v3641_v5 = vld [vmem:[#allocation7 + $0xec] ss:$16 sps:$4 sm:$0xff]  }
 0x326   :  { %v972_v12 = vadd.f32 %v925_v10, %v694_v4  ;;  %v927_v13 = vpop.f32.mrb[10].mxu0  ;;  %v968_v14 = vpop.f32.mrb[10].mxu1  ;;  %v974_v20 = vadd.f32 %v966_v11, %v696_v19  ;;  %v3638_v4 = vld [vmem:[#allocation7 + $0xe4] ss:$16 sps:$4 sm:$0xff]   ;;  %v3644_v7 = vld [vmem:[#allocation7 + $0xe0] ss:$16 sps:$4 sm:$0xff]   ;;  %v1012_v10 = vunpack.c.l.bf16 %v1010_v9  ;;  %v1013_v11 = vunpack.c.h.bf16 %v1010_v9 }
 0x327   :  { %v2753_v15 = vmul.f32 -1.442695, %v971_v8  ;;  %v928_v16 = vpop.f32.mrb[11].mxu0  ;;  %v969_v17 = vpop.f32.mrb[11].mxu1  ;;  %v3648_v8 = vld [vmem:[#allocation7 + $0xe8] ss:$16 sps:$4 sm:$0xff]  }
 0x328   :  { %v2754_v18 = vmul.f32 -1.442695, %v972_v12  ;;  %v2755_v22 = vmul.f32 -1.442695, %v974_v20 }
 0x329   :  { %3070 = vpow2.f32 %v2753_v15  ;;  %v1011_v15 = vld [vmem:[#allocation4 + $0x38] sm:$0xff] }
 0x32a   :  { %3072 = vpow2.f32 %v2754_v18 }
 0x32b   :  { %3074 = vpow2.f32 %v2755_v22 }
 0x32c   :  { %3076 = vtanh.f32 %v973_v23 }
 0x333   :  { %v3071_v24 = vpop.eup %3070 }
 0x334   :  { %v3073_v25 = vpop.eup %3072  ;;  %v978_v26 = vadd.f32 1.0, %v3071_v24 }
 0x335   :  { %v984_v27 = vadd.f32 1.0, %v3073_v25  ;;  %v3075_v28 = vpop.eup %3074  ;;  %v1015_v25 = vunpack.c.h.bf16 %v1011_v15 }
 0x336   :  { %3078 = vrcp.f32 %v978_v26  ;;  %v3077_v29 = vpop.eup %3076  ;;  %v991_v35 = vadd.f32 1.0, %v3075_v28 }
 0x337   :  { %3080 = vrcp.f32 %v984_v27  ;;  %v1014_v27 = vunpack.c.l.bf16 %v1011_v15 }
 0x338   :  { %3082 = vrcp.f32 %v991_v35 }
 0x340   :  { %v3079_v30 = vpop.eup %3078 }
 0x341   :  { %v3081_v31 = vpop.eup %3080  ;;  %v995_v32 = vmul.f32 %v3079_v30, %v3077_v29 }
 0x342   :  { %v994_v45 = vmul.f32 %v3081_v31, %v3516_v40  ;;  %v3083_v47 = vpop.eup %3082  ;;  %v3616_v40 = vld [vmem:[#allocation7 + $0xac] ss:$16 sps:$4 sm:$0xff]  }
 0x344   :  { %v3552_v46 = vadd.f32 %v995_v32, %v994_v45 }
 0x346   :  { %3084 = vtanh.f32 %v3552_v46 }
 0x350   :  { %v3085_v48 = vpop.eup %3084 }
 0x351   :  { %v998_v49 = vmul.f32 %v3085_v48, %v3083_v47 }
 0x353   :  { %v999_v50 = vpack.c.bf16 %v998_v49, %v998_v49 }
 0x355   :  { %1001 = vst [vmem:[#allocation9 + $0x8] sm:$0xf] %v999_v50  ;;  %1241 = vmatmul.mubr.bf16.vlgmr.msra.gmra.mrb[12].mxu0 %v999_v50  ;;  %1282 = vmatmul.mubr.bf16.vlgmr.msra.gmra.mrb[12].mxu1 %v999_v50 }
 0x356   :  { %1559 = vmatprep.mubr.bf16.mxu0 %v3288_v0  ;;  %1600 = vmatprep.mubr.bf16.mxu1 %v3288_v0 }
 0x357   :  { %1528 = vmatpush1.bf16.msra.mxu0 %v3561_v53  ;;  %1569 = vmatpush1.bf16.msra.mxu1 %v3563_v54 }
 0x358   :  { %1529 = vmatprep.subr.bf16.mxu0 %v3569_v55  ;;  %1570 = vmatprep.subr.bf16.mxu1 %v3571_v56 }
 0x35b   :  { %1530 = vmatpush1.bf16.msra.mxu0 %v3573_v1  ;;  %1571 = vmatpush1.bf16.msra.mxu1 %v3575_v6 }
 0x35c   :  { %1531 = vmatprep.subr.bf16.mxu0 %v3581_v57  ;;  %1572 = vmatprep.subr.bf16.mxu1 %v3583_v58 }
 0x35f   :  { %1532 = vmatpush1.bf16.msra.mxu0 %v3585_v59  ;;  %1573 = vmatpush1.bf16.msra.mxu1 %v3587_v60 }
 0x360   :  { %1533 = vmatprep.subr.bf16.mxu0 %v3593_v61  ;;  %1574 = vmatprep.subr.bf16.mxu1 %v3595_v62 }
 0x363   :  { %1534 = vmatpush1.bf16.msra.mxu0 %v3597_v63  ;;  %1575 = vmatpush1.bf16.msra.mxu1 %v3599_v33 }
 0x364   :  { %1535 = vmatprep.subr.bf16.mxu0 %v3607_v36  ;;  %1576 = vmatprep.subr.bf16.mxu1 %v3611_v38 }
 0x367   :  { %1536 = vmatpush1.bf16.msra.mxu0 %v3605_v34  ;;  %1577 = vmatpush1.bf16.msra.mxu1 %v3609_v37 }
 0x368   :  { %1537 = vmatprep.subr.bf16.mxu0 %v3613_v39  ;;  %1578 = vmatprep.subr.bf16.mxu1 %v3616_v40 }
 0x36b   :  { %1538 = vmatpush1.bf16.msra.mxu0 %v3620_v41  ;;  %1579 = vmatpush1.bf16.msra.mxu1 %v3624_v42 }
 0x36c   :  { %1539 = vmatprep.subr.bf16.mxu0 %v3626_v43  ;;  %1580 = vmatprep.subr.bf16.mxu1 %v3629_v44 }
 0x36f   :  { %1540 = vmatpush1.bf16.msra.mxu0 %v3632_v2  ;;  %1581 = vmatpush1.bf16.msra.mxu1 %v3636_v3 }
 0x370   :  { %1541 = vmatprep.subr.bf16.mxu0 %v3638_v4  ;;  %1582 = vmatprep.subr.bf16.mxu1 %v3641_v5 }
 0x373   :  { %1542 = vmatpush1.bf16.msra.mxu0 %v3644_v7  ;;  %1583 = vmatpush1.bf16.msra.mxu1 %v3648_v8 }
 0x374   :  { %1846 = vmatprep.subr.bf16.mxu0 %v3557_v51  ;;  %1887 = vmatprep.subr.bf16.mxu1 %v3559_v52 }
 0x428   :  { %v1242_v12 = vpop.f32.mrb[12].mxu0  ;;  %v1283_v13 = vpop.f32.mrb[12].mxu1 }
 0x429   :  { %v1290_v14 = vadd.f32 %v1242_v12, %v1012_v10  ;;  %v1244_v16 = vpop.f32.mrb[13].mxu0  ;;  %v1285_v17 = vpop.f32.mrb[13].mxu1  ;;  %v1292_v29 = vadd.f32 %v1283_v13, %v1014_v27 }
 0x42a   :  { %v1291_v18 = vadd.f32 %v1244_v16, %v1013_v11  ;;  %v1246_v19 = vpop.f32.mrb[14].mxu0  ;;  %v1287_v20 = vpop.f32.mrb[14].mxu1  ;;  %v1293_v26 = vadd.f32 %v1285_v17, %v1015_v25 }
 0x42b   :  { %v2788_v21 = vmul.f32 -1.442695, %v1290_v14  ;;  %v1247_v22 = vpop.f32.mrb[15].mxu0  ;;  %v1288_v23 = vpop.f32.mrb[15].mxu1 }
 0x42c   :  { %v2789_v24 = vmul.f32 -1.442695, %v1291_v18  ;;  %v2790_v28 = vmul.f32 -1.442695, %v1293_v26 }
 0x42d   :  { %3086 = vpow2.f32 %v2788_v21  ;;  %v1330_v21 = vld [vmem:[#allocation4 + $0x48] sm:$0xff] }
 0x42e   :  { %3088 = vpow2.f32 %v2789_v24 }
 0x42f   :  { %3090 = vpow2.f32 %v2790_v28 }
 0x430   :  { %3092 = vtanh.f32 %v1292_v29 }
 0x437   :  { %v3087_v30 = vpop.eup %3086 }
 0x438   :  { %v3089_v31 = vpop.eup %3088  ;;  %v1297_v32 = vadd.f32 1.0, %v3087_v30 }
 0x439   :  { %v1303_v35 = vadd.f32 1.0, %v3089_v31  ;;  %v3091_v45 = vpop.eup %3090  ;;  %v1334_v31 = vunpack.c.h.bf16 %v1330_v21 }
 0x43a   :  { %3094 = vrcp.f32 %v1297_v32  ;;  %v3093_v47 = vpop.eup %3092  ;;  %v1310_v9 = vadd.f32 1.0, %v3091_v45 }
 0x43b   :  { %3096 = vrcp.f32 %v1303_v35  ;;  %v1333_v35 = vunpack.c.l.bf16 %v1330_v21 }
 0x43c   :  { %3098 = vrcp.f32 %v1310_v9 }
 0x444   :  { %v3095_v48 = vpop.eup %3094 }
 0x445   :  { %v3097_v49 = vpop.eup %3096  ;;  %v1314_v50 = vmul.f32 %v3095_v48, %v3093_v47 }
 0x446   :  { %v1313_v10 = vmul.f32 %v3097_v49, %v3552_v46  ;;  %v3099_v12 = vpop.eup %3098  ;;  %v1329_v46 = vld [vmem:[#allocation4 + $0x40] sm:$0xff] }
 0x447   :  { %v1331_v16 = vunpack.c.l.bf16 %v1329_v46  ;;  %v1332_v17 = vunpack.c.h.bf16 %v1329_v46 }
 0x448   :  { %v3656_v11 = vadd.f32 %v1314_v50, %v1313_v10 }
 0x44a   :  { %3100 = vtanh.f32 %v3656_v11 }
 0x454   :  { %v3101_v13 = vpop.eup %3100 }
 0x455   :  { %v1317_v14 = vmul.f32 %v3101_v13, %v3099_v12 }
 0x457   :  { %v1318_v15 = vpack.c.bf16 %v1317_v14, %v1317_v14 }
 0x459   :  { %1320 = vst [vmem:[#allocation9 + $0xc] sm:$0xf] %v1318_v15  ;;  %1560 = vmatmul.mubr.bf16.vlgmr.msra.gmra.mrb[16].mxu0 %v1318_v15  ;;  %1601 = vmatmul.mubr.bf16.vlgmr.msra.gmra.mrb[16].mxu1 %v1318_v15 }
 0x45a   :  { %1847 = vmatpush1.bf16.msra.mxu0 %v3561_v53  ;;  %1888 = vmatpush1.bf16.msra.mxu1 %v3563_v54 }
 0x45b   :  { %1848 = vmatprep.subr.bf16.mxu0 %v3569_v55  ;;  %1889 = vmatprep.subr.bf16.mxu1 %v3571_v56 }
 0x45c   :  { %1878 = vmatprep.mubr.bf16.mxu0 %v3288_v0  ;;  %1919 = vmatprep.mubr.bf16.mxu1 %v3288_v0 }
 0x45e   :  { %1849 = vmatpush1.bf16.msra.mxu0 %v3573_v1  ;;  %1890 = vmatpush1.bf16.msra.mxu1 %v3575_v6 }
 0x45f   :  { %1850 = vmatprep.subr.bf16.mxu0 %v3581_v57  ;;  %1891 = vmatprep.subr.bf16.mxu1 %v3583_v58 }
 0x462   :  { %1851 = vmatpush1.bf16.msra.mxu0 %v3585_v59  ;;  %1892 = vmatpush1.bf16.msra.mxu1 %v3587_v60 }
 0x463   :  { %1852 = vmatprep.subr.bf16.mxu0 %v3593_v61  ;;  %1893 = vmatprep.subr.bf16.mxu1 %v3595_v62 }
 0x466   :  { %1853 = vmatpush1.bf16.msra.mxu0 %v3597_v63  ;;  %1894 = vmatpush1.bf16.msra.mxu1 %v3599_v33 }
 0x467   :  { %1854 = vmatprep.subr.bf16.mxu0 %v3607_v36  ;;  %1895 = vmatprep.subr.bf16.mxu1 %v3611_v38 }
 0x46a   :  { %1855 = vmatpush1.bf16.msra.mxu0 %v3605_v34  ;;  %1896 = vmatpush1.bf16.msra.mxu1 %v3609_v37 }
 0x46b   :  { %1856 = vmatprep.subr.bf16.mxu0 %v3613_v39  ;;  %1897 = vmatprep.subr.bf16.mxu1 %v3616_v40 }
 0x46e   :  { %1857 = vmatpush1.bf16.msra.mxu0 %v3620_v41  ;;  %1898 = vmatpush1.bf16.msra.mxu1 %v3624_v42 }
 0x46f   :  { %1858 = vmatprep.subr.bf16.mxu0 %v3626_v43  ;;  %1899 = vmatprep.subr.bf16.mxu1 %v3629_v44 }
 0x472   :  { %1859 = vmatpush1.bf16.msra.mxu0 %v3632_v2  ;;  %1900 = vmatpush1.bf16.msra.mxu1 %v3636_v3 }
 0x473   :  { %1860 = vmatprep.subr.bf16.mxu0 %v3638_v4  ;;  %1901 = vmatprep.subr.bf16.mxu1 %v3641_v5 }
 0x476   :  { %1861 = vmatpush1.bf16.msra.mxu0 %v3644_v7  ;;  %1902 = vmatpush1.bf16.msra.mxu1 %v3648_v8 }
 0x477   :  { %2165 = vmatprep.subr.bf16.mxu0 %v3557_v51  ;;  %2206 = vmatprep.subr.bf16.mxu1 %v3559_v52 }
 0x52c   :  { %v1561_v18 = vpop.f32.mrb[16].mxu0  ;;  %v1602_v19 = vpop.f32.mrb[16].mxu1 }
 0x52d   :  { %v1609_v20 = vadd.f32 %v1561_v18, %v1331_v16  ;;  %v1563_v22 = vpop.f32.mrb[17].mxu0  ;;  %v1604_v23 = vpop.f32.mrb[17].mxu1  ;;  %v1611_v47 = vadd.f32 %v1602_v19, %v1333_v35 }
 0x52e   :  { %v1610_v24 = vadd.f32 %v1563_v22, %v1332_v17  ;;  %v1565_v25 = vpop.f32.mrb[18].mxu0  ;;  %v1606_v26 = vpop.f32.mrb[18].mxu1  ;;  %v1612_v32 = vadd.f32 %v1604_v23, %v1334_v31 }
 0x52f   :  { %v2823_v27 = vmul.f32 -1.442695, %v1609_v20  ;;  %v1566_v28 = vpop.f32.mrb[19].mxu0  ;;  %v1607_v29 = vpop.f32.mrb[19].mxu1 }
 0x530   :  { %v2824_v30 = vmul.f32 -1.442695, %v1610_v24  ;;  %v2825_v45 = vmul.f32 -1.442695, %v1612_v32 }
 0x531   :  { %3102 = vpow2.f32 %v2823_v27  ;;  %v1649_v27 = vld [vmem:[#allocation4 + $0x58] sm:$0xff] }
 0x532   :  { %3104 = vpow2.f32 %v2824_v30 }
 0x533   :  { %3106 = vpow2.f32 %v2825_v45 }
 0x534   :  { %3108 = vtanh.f32 %v1611_v47 }
 0x53b   :  { %v3103_v48 = vpop.eup %3102 }
 0x53c   :  { %v3105_v49 = vpop.eup %3104  ;;  %v1616_v50 = vadd.f32 1.0, %v3103_v48 }
 0x53d   :  { %v1622_v9 = vadd.f32 1.0, %v3105_v49  ;;  %v3107_v10 = vpop.eup %3106  ;;  %v1653_v49 = vunpack.c.h.bf16 %v1649_v27 }
 0x53e   :  { %3110 = vrcp.f32 %v1616_v50  ;;  %v3109_v12 = vpop.eup %3108  ;;  %v1629_v46 = vadd.f32 1.0, %v3107_v10 }
 0x53f   :  { %3112 = vrcp.f32 %v1622_v9 }
 0x540   :  { %3114 = vrcp.f32 %v1629_v46 }
 0x548   :  { %v3111_v13 = vpop.eup %3110 }
 0x549   :  { %v3113_v14 = vpop.eup %3112  ;;  %v1633_v15 = vmul.f32 %v3111_v13, %v3109_v12 }
 0x54a   :  { %v1632_v16 = vmul.f32 %v3113_v14, %v3656_v11  ;;  %v3115_v18 = vpop.eup %3114  ;;  %v1648_v11 = vld [vmem:[#allocation4 + $0x50] sm:$0xff] }
 0x54b   :  { %v1650_v22 = vunpack.c.l.bf16 %v1648_v11  ;;  %v1651_v23 = vunpack.c.h.bf16 %v1648_v11 }
 0x54c   :  { %v3694_v17 = vadd.f32 %v1633_v15, %v1632_v16 }
 0x54e   :  { %3116 = vtanh.f32 %v3694_v17 }
 0x558   :  { %v3117_v19 = vpop.eup %3116 }
 0x559   :  { %v1636_v20 = vmul.f32 %v3117_v19, %v3115_v18 }
 0x55b   :  { %v1637_v21 = vpack.c.bf16 %v1636_v20, %v1636_v20 }
 0x55d   :  { %1639 = vst [vmem:[#allocation9 + $0x10] sm:$0xf] %v1637_v21  ;;  %1879 = vmatmul.mubr.bf16.vlgmr.msra.gmra.mrb[20].mxu0 %v1637_v21  ;;  %1920 = vmatmul.mubr.bf16.vlgmr.msra.gmra.mrb[20].mxu1 %v1637_v21 }
 0x55e   :  { %2166 = vmatpush1.bf16.msra.mxu0 %v3561_v53  ;;  %2207 = vmatpush1.bf16.msra.mxu1 %v3563_v54 }
 0x55f   :  { %2167 = vmatprep.subr.bf16.mxu0 %v3569_v55  ;;  %2208 = vmatprep.subr.bf16.mxu1 %v3571_v56 }
 0x560   :  { %2197 = vmatprep.mubr.bf16.mxu0 %v3288_v0  ;;  %2238 = vmatprep.mubr.bf16.mxu1 %v3288_v0 }
 0x562   :  { %2168 = vmatpush1.bf16.msra.mxu0 %v3573_v1  ;;  %2209 = vmatpush1.bf16.msra.mxu1 %v3575_v6 }
 0x563   :  { %2169 = vmatprep.subr.bf16.mxu0 %v3581_v57  ;;  %2210 = vmatprep.subr.bf16.mxu1 %v3583_v58 }
 0x566   :  { %2170 = vmatpush1.bf16.msra.mxu0 %v3585_v59  ;;  %2211 = vmatpush1.bf16.msra.mxu1 %v3587_v60 }
 0x567   :  { %2171 = vmatprep.subr.bf16.mxu0 %v3593_v61  ;;  %2212 = vmatprep.subr.bf16.mxu1 %v3595_v62 }
 0x56a   :  { %2172 = vmatpush1.bf16.msra.mxu0 %v3597_v63  ;;  %2213 = vmatpush1.bf16.msra.mxu1 %v3599_v33 }
 0x56b   :  { %2173 = vmatprep.subr.bf16.mxu0 %v3607_v36  ;;  %2214 = vmatprep.subr.bf16.mxu1 %v3611_v38 }
 0x56e   :  { %2174 = vmatpush1.bf16.msra.mxu0 %v3605_v34  ;;  %2215 = vmatpush1.bf16.msra.mxu1 %v3609_v37 }
 0x56f   :  { %2175 = vmatprep.subr.bf16.mxu0 %v3613_v39  ;;  %2216 = vmatprep.subr.bf16.mxu1 %v3616_v40 }
 0x572   :  { %2176 = vmatpush1.bf16.msra.mxu0 %v3620_v41  ;;  %2217 = vmatpush1.bf16.msra.mxu1 %v3624_v42 }
 0x573   :  { %2177 = vmatprep.subr.bf16.mxu0 %v3626_v43  ;;  %2218 = vmatprep.subr.bf16.mxu1 %v3629_v44 }
 0x576   :  { %2178 = vmatpush1.bf16.msra.mxu0 %v3632_v2  ;;  %2219 = vmatpush1.bf16.msra.mxu1 %v3636_v3 }
 0x577   :  { %2179 = vmatprep.subr.bf16.mxu0 %v3638_v4  ;;  %2220 = vmatprep.subr.bf16.mxu1 %v3641_v5 }
 0x57a   :  { %2180 = vmatpush1.bf16.msra.mxu0 %v3644_v7  ;;  %2221 = vmatpush1.bf16.msra.mxu1 %v3648_v8 }
 0x57b   :  { %2484 = vmatprep.subr.bf16.mxu0 %v3557_v51  ;;  %2525 = vmatprep.subr.bf16.mxu1 %v3559_v52  ;;  %v1652_v52 = vunpack.c.l.bf16 %v1649_v27 }
 0x630   :  { %v1880_v24 = vpop.f32.mrb[20].mxu0  ;;  %v1921_v25 = vpop.f32.mrb[20].mxu1 }
 0x631   :  { %v1928_v26 = vadd.f32 %v1880_v24, %v1650_v22  ;;  %v1882_v28 = vpop.f32.mrb[21].mxu0  ;;  %v1923_v29 = vpop.f32.mrb[21].mxu1  ;;  %v1930_v9 = vadd.f32 %v1921_v25, %v1652_v52 }
 0x632   :  { %v1929_v30 = vadd.f32 %v1882_v28, %v1651_v23  ;;  %v1884_v31 = vpop.f32.mrb[22].mxu0  ;;  %v1925_v32 = vpop.f32.mrb[22].mxu1  ;;  %v1931_v51 = vadd.f32 %v1923_v29, %v1653_v49  ;;  %v2287_v49 = vld [vmem:[#allocation4 + $0x78] sm:$0xff] }
 0x633   :  { %v2858_v35 = vmul.f32 -1.442695, %v1928_v26  ;;  %v1885_v45 = vpop.f32.mrb[23].mxu0  ;;  %v1926_v47 = vpop.f32.mrb[23].mxu1  ;;  %v2286_v31 = vld [vmem:[#allocation4 + $0x70] sm:$0xff] }
 0x634   :  { %v2859_v48 = vmul.f32 -1.442695, %v1929_v30  ;;  %v2860_v50 = vmul.f32 -1.442695, %v1931_v51  ;;  %v2288_v32 = vunpack.c.l.bf16 %v2286_v31 }
 0x635   :  { %3118 = vpow2.f32 %v2858_v35  ;;  %v2289_v35 = vunpack.c.h.bf16 %v2286_v31 }
 0x636   :  { %3120 = vpow2.f32 %v2859_v48 }
 0x637   :  { %3122 = vpow2.f32 %v2860_v50 }
 0x638   :  { %3124 = vtanh.f32 %v1930_v9 }
 0x63f   :  { %v3119_v10 = vpop.eup %3118 }
 0x640   :  { %v3121_v12 = vpop.eup %3120  ;;  %v1935_v13 = vadd.f32 1.0, %v3119_v10 }
 0x641   :  { %v1941_v14 = vadd.f32 1.0, %v3121_v12  ;;  %v3123_v15 = vpop.eup %3122 }
 0x642   :  { %3126 = vrcp.f32 %v1935_v13  ;;  %v3125_v46 = vpop.eup %3124  ;;  %v1948_v20 = vadd.f32 1.0, %v3123_v15 }
 0x643   :  { %3128 = vrcp.f32 %v1941_v14 }
 0x644   :  { %3130 = vrcp.f32 %v1948_v20 }
 0x64c   :  { %v3127_v16 = vpop.eup %3126 }
 0x64d   :  { %v3129_v18 = vpop.eup %3128  ;;  %v1952_v19 = vmul.f32 %v3127_v16, %v3125_v46  ;;  %v2291_v46 = vunpack.c.h.bf16 %v2287_v49 }
 0x64e   :  { %v1951_v21 = vmul.f32 %v3129_v18, %v3694_v17  ;;  %v3131_v22 = vpop.eup %3130  ;;  %v2290_v18 = vunpack.c.l.bf16 %v2287_v49 }
 0x650   :  { %v3732_v11 = vadd.f32 %v1952_v19, %v1951_v21 }
 0x652   :  { %3132 = vtanh.f32 %v3732_v11 }
 0x65c   :  { %v3133_v23 = vpop.eup %3132 }
 0x65d   :  { %v1955_v24 = vmul.f32 %v3133_v23, %v3131_v22 }
 0x65f   :  { %v1956_v25 = vpack.c.bf16 %v1955_v24, %v1955_v24 }
 0x661   :  { %1958 = vst [vmem:[#allocation9 + $0x14] sm:$0xf] %v1956_v25  ;;  %2198 = vmatmul.mubr.bf16.vlgmr.msra.gmra.mrb[24].mxu0 %v1956_v25  ;;  %2239 = vmatmul.mubr.bf16.vlgmr.msra.gmra.mrb[24].mxu1 %v1956_v25 }
 0x662   :  { %2485 = vmatpush1.bf16.msra.mxu0 %v3561_v53  ;;  %2526 = vmatpush1.bf16.msra.mxu1 %v3563_v54 }
 0x663   :  { %2486 = vmatprep.subr.bf16.mxu0 %v3569_v55  ;;  %2527 = vmatprep.subr.bf16.mxu1 %v3571_v56 }
 0x664   :  { %2516 = vmatprep.mubr.bf16.mxu0 %v3288_v0  ;;  %2557 = vmatprep.mubr.bf16.mxu1 %v3288_v0  ;;  %v1967_v0 = vld [vmem:[#allocation4 + $0x60] sm:$0xff] }
 0x665   :  { %v1969_v53 = vunpack.c.l.bf16 %v1967_v0  ;;  %v1970_v54 = vunpack.c.h.bf16 %v1967_v0 }
 0x666   :  { %2487 = vmatpush1.bf16.msra.mxu0 %v3573_v1  ;;  %2528 = vmatpush1.bf16.msra.mxu1 %v3575_v6  ;;  %v1968_v6 = vld [vmem:[#allocation4 + $0x68] sm:$0xff] }
 0x667   :  { %2488 = vmatprep.subr.bf16.mxu0 %v3581_v57  ;;  %2529 = vmatprep.subr.bf16.mxu1 %v3583_v58 }
 0x66a   :  { %2489 = vmatpush1.bf16.msra.mxu0 %v3585_v59  ;;  %2530 = vmatpush1.bf16.msra.mxu1 %v3587_v60 }
 0x66b   :  { %2490 = vmatprep.subr.bf16.mxu0 %v3593_v61  ;;  %2531 = vmatprep.subr.bf16.mxu1 %v3595_v62 }
 0x66e   :  { %2491 = vmatpush1.bf16.msra.mxu0 %v3597_v63  ;;  %2532 = vmatpush1.bf16.msra.mxu1 %v3599_v33 }
 0x66f   :  { %2492 = vmatprep.subr.bf16.mxu0 %v3607_v36  ;;  %2533 = vmatprep.subr.bf16.mxu1 %v3611_v38  ;;  %v1972_v36 = vunpack.c.h.bf16 %v1968_v6  ;;  %v1971_v38 = vunpack.c.l.bf16 %v1968_v6 }
 0x672   :  { %2493 = vmatpush1.bf16.msra.mxu0 %v3605_v34  ;;  %2534 = vmatpush1.bf16.msra.mxu1 %v3609_v37 }
 0x673   :  { %2494 = vmatprep.subr.bf16.mxu0 %v3613_v39  ;;  %2535 = vmatprep.subr.bf16.mxu1 %v3616_v40 }
 0x676   :  { %2495 = vmatpush1.bf16.msra.mxu0 %v3620_v41  ;;  %2536 = vmatpush1.bf16.msra.mxu1 %v3624_v42 }
 0x677   :  { %2496 = vmatprep.subr.bf16.mxu0 %v3626_v43  ;;  %2537 = vmatprep.subr.bf16.mxu1 %v3629_v44 }
 0x67a   :  { %2497 = vmatpush1.bf16.msra.mxu0 %v3632_v2  ;;  %2538 = vmatpush1.bf16.msra.mxu1 %v3636_v3 }
 0x67b   :  { %2498 = vmatprep.subr.bf16.mxu0 %v3638_v4  ;;  %2539 = vmatprep.subr.bf16.mxu1 %v3641_v5 }
 0x67e   :  { %2499 = vmatpush1.bf16.msra.mxu0 %v3644_v7  ;;  %2540 = vmatpush1.bf16.msra.mxu1 %v3648_v8 }
 0x734   :  { %v2199_v55 = vpop.f32.mrb[24].mxu0  ;;  %v2240_v56 = vpop.f32.mrb[24].mxu1 }
 0x735   :  { %v2247_v1 = vadd.f32 %v2199_v55, %v1969_v53  ;;  %v2201_v57 = vpop.f32.mrb[25].mxu0  ;;  %v2242_v58 = vpop.f32.mrb[25].mxu1  ;;  %v2249_v40 = vadd.f32 %v2240_v56, %v1971_v38 }
 0x736   :  { %v2248_v59 = vadd.f32 %v2201_v57, %v1970_v54  ;;  %v2203_v60 = vpop.f32.mrb[26].mxu0  ;;  %v2244_v61 = vpop.f32.mrb[26].mxu1  ;;  %v2250_v37 = vadd.f32 %v2242_v58, %v1972_v36 }
 0x737   :  { %v2893_v62 = vmul.f32 -1.442695, %v2247_v1  ;;  %v2204_v63 = vpop.f32.mrb[27].mxu0  ;;  %v2245_v33 = vpop.f32.mrb[27].mxu1 }
 0x738   :  { %v2894_v34 = vmul.f32 -1.442695, %v2248_v59  ;;  %v2895_v39 = vmul.f32 -1.442695, %v2250_v37 }
 0x739   :  { %3134 = vpow2.f32 %v2893_v62 }
 0x73a   :  { %3136 = vpow2.f32 %v2894_v34 }
 0x73b   :  { %3138 = vpow2.f32 %v2895_v39 }
 0x73c   :  { %3140 = vtanh.f32 %v2249_v40 }
 0x743   :  { %v3135_v41 = vpop.eup %3134 }
 0x744   :  { %v3137_v42 = vpop.eup %3136  ;;  %v2254_v43 = vadd.f32 1.0, %v3135_v41 }
 0x745   :  { %v2260_v44 = vadd.f32 1.0, %v3137_v42  ;;  %v3139_v2 = vpop.eup %3138 }
 0x746   :  { %3142 = vrcp.f32 %v2254_v43  ;;  %v3141_v3 = vpop.eup %3140  ;;  %v2267_v8 = vadd.f32 1.0, %v3139_v2 }
 0x747   :  { %3144 = vrcp.f32 %v2260_v44 }
 0x748   :  { %3146 = vrcp.f32 %v2267_v8 }
 0x750   :  { %v3143_v4 = vpop.eup %3142 }
 0x751   :  { %v3145_v5 = vpop.eup %3144  ;;  %v2271_v7 = vmul.f32 %v3143_v4, %v3141_v3 }
 0x752   :  { %v2270_v17 = vmul.f32 %v3145_v5, %v3732_v11  ;;  %v3147_v27 = vpop.eup %3146 }
 0x754   :  { %v2272_v26 = vadd.f32 %v2271_v7, %v2270_v17 }
 0x756   :  { %3148 = vtanh.f32 %v2272_v26 }
 0x760   :  { %v3149_v28 = vpop.eup %3148 }
 0x761   :  { %v2274_v29 = vmul.f32 %v3149_v28, %v3147_v27 }
 0x763   :  { %v2275_v30 = vpack.c.bf16 %v2274_v29, %v2274_v29 }
 0x765   :  { %2277 = vst [vmem:[#allocation9 + $0x18] sm:$0xf] %v2275_v30  ;;  %2517 = vmatmul.mubr.bf16.vlgmr.msra.gmra.mrb[28].mxu0 %v2275_v30  ;;  %2558 = vmatmul.mubr.bf16.vlgmr.msra.gmra.mrb[28].mxu1 %v2275_v30 }
 0x838   :  { %v2518_v45 = vpop.f32.mrb[28].mxu0  ;;  %v2559_v47 = vpop.f32.mrb[28].mxu1 }
 0x839   :  { %v2566_v48 = vadd.f32 %v2518_v45, %v2288_v32  ;;  %v2520_v51 = vpop.f32.mrb[29].mxu0  ;;  %v2561_v52 = vpop.f32.mrb[29].mxu1  ;;  %v2568_v20 = vadd.f32 %v2559_v47, %v2290_v18 }
 0x83a   :  { %v2567_v50 = vadd.f32 %v2520_v51, %v2289_v35  ;;  %v2522_v9 = vpop.f32.mrb[30].mxu0  ;;  %v2563_v10 = vpop.f32.mrb[30].mxu1  ;;  %v2569_v16 = vadd.f32 %v2561_v52, %v2291_v46 }
 0x83b   :  { %v2928_v12 = vmul.f32 -1.442695, %v2566_v48  ;;  %v2523_v13 = vpop.f32.mrb[31].mxu0  ;;  %v2564_v14 = vpop.f32.mrb[31].mxu1 }
 0x83c   :  { %v2929_v15 = vmul.f32 -1.442695, %v2567_v50  ;;  %v2930_v19 = vmul.f32 -1.442695, %v2569_v16 }
 0x83d   :  { %3150 = vpow2.f32 %v2928_v12 }
 0x83e   :  { %3152 = vpow2.f32 %v2929_v15 }
 0x83f   :  { %3154 = vpow2.f32 %v2930_v19 }
 0x840   :  { %3156 = vtanh.f32 %v2568_v20 }
 0x847   :  { %v3151_v21 = vpop.eup %3150 }
 0x848   :  { %v3153_v11 = vpop.eup %3152  ;;  %v2573_v22 = vadd.f32 1.0, %v3151_v21 }
 0x849   :  { %v2579_v23 = vadd.f32 1.0, %v3153_v11  ;;  %v3155_v24 = vpop.eup %3154 }
 0x84a   :  { %3158 = vrcp.f32 %v2573_v22  ;;  %v3157_v25 = vpop.eup %3156  ;;  %v2586_v55 = vadd.f32 1.0, %v3155_v24 }
 0x84b   :  { %3160 = vrcp.f32 %v2579_v23 }
 0x84c   :  { %3162 = vrcp.f32 %v2586_v55 }
 0x854   :  { %v3159_v0 = vpop.eup %3158 }
 0x855   :  { %v3161_v53 = vpop.eup %3160  ;;  %v2590_v54 = vmul.f32 %v3159_v0, %v3157_v25 }
 0x856   :  { %v2589_v56 = vmul.f32 %v3161_v53, %v2272_v26  ;;  %v3163_v6 = vpop.eup %3162 }
 0x858   :  { %v2591_v1 = vadd.f32 %v2590_v54, %v2589_v56 }
 0x85a   :  { %3164 = vtanh.f32 %v2591_v1  ;;  %2603 = vst [vmem:[#allocation12] sm:$0xff] %v2591_v1 }
 0x864   :  { %v3165_v57 = vpop.eup %3164 }
 0x865   :  { %v2593_v58 = vmul.f32 %v3165_v57, %v3163_v6 }
 0x867   :  { %v2594_v59 = vpack.c.bf16 %v2593_v58, %v2593_v58  ;;  %2602 = vst [vmem:[#allocation10] sm:$0xff] %v2593_v58 }
 0x868   :  { %3221 = shalt.err (!%p3218_p6)
}
 0x869   :  { %s3222_s22 = scalar_lea.hbm %s3821_s3, 128 }
 0x86a   :  { %p3223_p7 = scmp.ne.s32.totalorder %s3821_s3, %s3222_s22  ;;  %p3226_p8 = scmp.lt.u32.totalorder %s3222_s22, %s3821_s3 }
 0x86c   :  { %p3228_p9 = pnand %p3226_p8, %p3223_p7 }
 0x86e   :  { %3231 = shalt.err (!%p3228_p9)
}
 0x86f   :  { %2627 = dma.vmem_to_hbm [thread:$0]  %s2625_s14, 128, %s3821_s3, [#allocation11]   ;;  %2596 = vst [vmem:[#allocation9 + $0x1c] sm:$0xf] %v2594_v59 }
 0x870   :  { %s3232_s29 = scalar_lea.vmem %s3770_s18, 128  ;;  %p3237_p11 = scmp.lt.s32.totalorder %s3770_s18, %s3770_s18 }
 0x871   :  { %p3233_p10 = scmp.ne.s32.totalorder %s3770_s18, %s3232_s29  ;;  %p3238_p12 = scmp.lt.s32.totalorder %s3232_s29, %s3232_s29 }
 0x873   :  { %p3239_p13 = por %p3238_p12, %p3237_p11 }
 0x875   :  { %p3240_p0 = pnand %p3239_p13, %p3233_p10 }
 0x877   :  { %3243 = shalt.err (!%p3240_p0)
}
 0x878   :  { %s3244_s6 = scalar_lea.hbm %s3822_s4, 128 }
 0x879   :  { %p3245_p1 = scmp.ne.s32.totalorder %s3822_s4, %s3244_s6  ;;  %p3248_p2 = scmp.lt.u32.totalorder %s3244_s6, %s3822_s4 }
 0x87b   :  { %p3250_p3 = pnand %p3248_p2, %p3245_p1 }
 0x87d   :  { %3253 = shalt.err (!%p3250_p3)
}
 0x87e   :  { %2637 = dma.vmem_to_hbm [thread:$0]  %s3770_s18, 128, %s3822_s4, [#allocation11]  }
 0x87f   :  { %s3254_s12 = scalar_lea.vmem %s3768_s16, 512  ;;  %p3259_p5 = scmp.lt.s32.totalorder %s3768_s16, %s3768_s16 }
 0x880   :  { %p3255_p4 = scmp.ne.s32.totalorder %s3768_s16, %s3254_s12  ;;  %p3260_p6 = scmp.lt.s32.totalorder %s3254_s12, %s3254_s12 }
 0x882   :  { %p3261_p7 = por %p3260_p6, %p3259_p5 }
 0x884   :  { %p3262_p8 = pnand %p3261_p7, %p3255_p4 }
 0x886   :  { %3265 = shalt.err (!%p3262_p8)
}
 0x887   :  { %s3266_s1 = scalar_lea.hbm %s3820_s2, 512 }
 0x888   :  { %p3267_p9 = scmp.ne.s32.totalorder %s3820_s2, %s3266_s1  ;;  %p3270_p10 = scmp.lt.u32.totalorder %s3266_s1, %s3820_s2 }
 0x88a   :  { %p3272_p11 = pnand %p3270_p10, %p3267_p9 }
 0x88c   :  { %3275 = shalt.err (!%p3272_p11)
}
 0x88d   :  { %s3293_s4 = smov 64   ;;  %s3294_s18 = smov 4  }
 0x88e   :  { %2617 = dma.vmem_to_hbm [thread:$0]  %s3768_s16, 512, %s3820_s2, [#allocation6], %s3293_s4, %s3293_s4, %s3294_s18  }
 0x88f   :  { %3280 = dma.done.wait [#allocation6], 512  }
 0x890   :  { %3281 = vsyncadd [#allocation6], 4294966784 }
 0x891   :  { %3282 = dma.done.wait [#allocation11], 256  }
 0x892   :  { %3283 = vsyncadd [#allocation11], 4294967040 }
 0x893   :  { %2647 = vsyncpa [#allocation5], 1 }
 0x894   :  { %2648 = vsyncpa [#allocation8], 1 }
 0x895   :  { %2649 = vsyncpa [#allocation6], 1 }
 0x896   :  { %2650 = vsyncpa [#allocation11], 1 }

</bundles_post_ra>
